<compile_context>
chip_gen: v5e
topology: v5e:2x2
jax: 0.10.0
libtpu: 0.0.40
codegen_flags: <defaults>
</compile_context>

<pallas_src>
import functools

import jax
import jax.numpy as jnp
import numpy as np
from jax.experimental import pallas as pl
from jax.experimental.pallas import tpu as pltpu

IN_FEATS = 3197
K_PAD = 3200          # 25 * 128: lane-aligned reduction dim for fc1
H1 = 128              # fc1 out features (before pool)
H1_HALF = H1 // 2     # 64
H2 = 64               # fc2 out features (before pool)
H2_HALF = H2 // 2     # 32
OUT = 2
THRESH = 1.0          # snn.Leaky default threshold


def net_kernel(x_ref, w1_ref, b1_ref, w2_ref, b2_ref, w3_ref, b3_ref, out_ref, xs_ref):
    tb = xs_ref.shape[0]

    # Stage x into a lane-aligned bf16 buffer: zero the last 128-lane group first
    # (covers pad columns 3197..3199 so uninitialized VMEM / NaNs can't leak into the
    # matmul), then overwrite the real 3197 columns with the cast input.  Done every
    # step (cheap) so it stays correct when the grid is split across TensorCores.
    xs_ref[:, K_PAD - 128:] = jnp.zeros((tb, 128), dtype=xs_ref.dtype)
    xs_ref[:, :IN_FEATS] = x_ref[...].astype(jnp.bfloat16)

    # --- fc1 (bf16 x bf16 -> f32 accum on MXU) + folded max_pool1d(2)
    h = jnp.dot(xs_ref[...], w1_ref[...],
                preferred_element_type=jnp.float32) + b1_ref[...]        # (tb, 128)
    cur1 = jnp.maximum(h[:, :H1_HALF], h[:, H1_HALF:])                   # (tb, 64)

    # --- lif1: mem1 = beta*0 + cur1 ; spk1 = heaviside(mem1 - threshold)
    spk1 = (cur1 > THRESH).astype(jnp.float32)

    # --- fc2 + folded max_pool1d(2)   (tiny, kept f32; hidden under the x DMA)
    g = jnp.dot(spk1, w2_ref[...],
                preferred_element_type=jnp.float32) + b2_ref[...]        # (tb, 64)
    cur2 = jnp.maximum(g[:, :H2_HALF], g[:, H2_HALF:])                   # (tb, 32)

    # --- lif2
    spk2 = (cur2 > THRESH).astype(jnp.float32)

    # --- fc3 (spk2.view(B, -1) is identity: already (tb, 32))
    out_ref[...] = jnp.dot(spk2, w3_ref[...],
                           preferred_element_type=jnp.float32) + b3_ref[...]


def prepare_params(params):
    """One-time weight prep: permute output columns to [even | odd] halves so
    max_pool1d(2) becomes a max of contiguous halves, zero-pad fc1's K to 3200,
    cast the dominant fc1 weight to bf16."""
    w1, b1, w2, b2, w3, b3 = params

    w1p = jnp.concatenate([w1[:, 0::2], w1[:, 1::2]], axis=1)            # (3197, 128)
    w1p = jnp.pad(w1p, ((0, K_PAD - IN_FEATS), (0, 0)))                  # (3200, 128)
    b1p = jnp.concatenate([b1[0::2], b1[1::2]])[None, :]                 # (1, 128)

    w2p = jnp.concatenate([w2[:, 0::2], w2[:, 1::2]], axis=1)            # (64, 64)
    b2p = jnp.concatenate([b2[0::2], b2[1::2]])[None, :]                 # (1, 64)

    return (w1p.astype(jnp.bfloat16),
            b1p.astype(jnp.float32),
            w2p.astype(jnp.float32),
            b2p.astype(jnp.float32),
            w3.astype(jnp.float32),
            b3[None, :].astype(jnp.float32))


def _round_up(n, m):
    return ((n + m - 1) // m) * m


def _pick_tb(B, block_b):
    """Batch tile: multiple of 8 (or the full batch), >=2 grid steps when B >= 16
    (so both v7x TensorCores get work), preferring tiles that divide B exactly so
    no batch padding copy is needed."""
    if B <= block_b:
        if B >= 16 and B % 16 == 0:
            return B // 2                      # two grid steps, both multiples of 8
        return B                               # single full-dim block (any B allowed)
    # Large batch: search downward for a multiple-of-8 divisor of B (no padding).
    for cand in range(block_b, max(block_b - 128, 8) - 1, -8):
        if B % cand == 0:
            return cand
    return block_b                             # rare fallback: pad the batch


@functools.partial(jax.jit, static_argnames=("block_b",))
def net_forward(x, prep, block_b=256):
    assert block_b % 8 == 0
    w1p, b1p, w2p, b2p, w3, b3 = prep
    B = x.shape[0]

    tb = _pick_tb(B, block_b)
    b_pad = _round_up(B, tb)
    # Only materialize a padded copy when the batch is ragged w.r.t. the tile.
    x_in = x if b_pad == B else jnp.pad(x, ((0, b_pad - B), (0, 0)))

    grid = (b_pad // tb,)

    # VMEM budget: 2 x f32 x-tile + bf16 staging + ~1.7 MB resident weights.
    # Default limits are fine for tb <= 256; raise the scoped limit for bigger tiles.
    vmem_bytes = None
    if tb > 256:
        vmem_bytes = int((2 * tb * IN_FEATS * x_in.dtype.itemsize
                          + tb * K_PAD * 2) * 1.2) + (4 << 20)

    out = pl.pallas_call(
        net_kernel,
        out_shape=jax.ShapeDtypeStruct((b_pad, OUT), jnp.float32),
        grid=grid,
        in_specs=[
            pl.BlockSpec((tb, IN_FEATS), lambda i: (i, 0)),     # x: tiled over batch, full K
            pl.BlockSpec((K_PAD, H1), lambda i: (0, 0)),        # w1: resident (bf16)
            pl.BlockSpec((1, H1), lambda i: (0, 0)),            # b1: resident
            pl.BlockSpec((H2, H2), lambda i: (0, 0)),           # w2: resident
            pl.BlockSpec((1, H2), lambda i: (0, 0)),            # b2: resident
            pl.BlockSpec((H2_HALF, OUT), lambda i: (0, 0)),     # w3: resident
            pl.BlockSpec((1, OUT), lambda i: (0, 0)),           # b3: resident
        ],
        out_specs=pl.BlockSpec((tb, OUT), lambda i: (i, 0)),
        scratch_shapes=[pltpu.VMEM((tb, K_PAD), jnp.bfloat16)],  # bf16 staging for fc1
        compiler_params=pltpu.CompilerParams(
            dimension_semantics=("parallel",),
            vmem_limit_bytes=vmem_bytes),
    )(x_in, w1p, b1p, w2p, b2p, w3, b3)

    return out[:B]


def ref_forward(x, params):
    """Pure-JAX reference matching the PyTorch forward (with the same bf16 fc1
    rounding the kernel applies, so spike decisions are identical)."""
    w1, b1, w2, b2, w3, b3 = params
    h = jnp.dot(x.astype(jnp.bfloat16), w1.astype(jnp.bfloat16),
                preferred_element_type=jnp.float32) + b1
    cur1 = jnp.max(h.reshape(h.shape[0], -1, 2), axis=-1)
    spk1 = (cur1 > THRESH).astype(jnp.float32)
    g = spk1 @ w2 + b2
    cur2 = jnp.max(g.reshape(g.shape[0], -1, 2), axis=-1)
    spk2 = (cur2 > THRESH).astype(jnp.float32)
    return spk2 @ w3 + b3


def init_params(key):
    """Deterministic init mimicking PyTorch Linear default: U(-1/sqrt(fan_in), 1/sqrt(fan_in))."""
    ks = jax.random.split(key, 6)

    def lin(kw, kb, fan_in, fan_out):
        bound = 1.0 / np.sqrt(fan_in)
        w = jax.random.uniform(kw, (fan_in, fan_out), jnp.float32, -bound, bound)
        b = jax.random.uniform(kb, (fan_out,), jnp.float32, -bound, bound)
        return w, b

    w1, b1 = lin(ks[0], ks[1], IN_FEATS, H1)   # fc1: Linear(3197, 128)
    w2, b2 = lin(ks[2], ks[3], H2, H2)         # fc2: Linear(64, 64)
    w3, b3 = lin(ks[4], ks[5], H2_HALF, OUT)   # fc3: Linear(32, 2)
    return (w1, b1, w2, b2, w3, b3)


if __name__ == "__main__":
    key = jax.random.PRNGKey(0)
    k_param, k_x = jax.random.split(key)

    params = init_params(k_param)
    prep = prepare_params(params)          # one-time: permute / pad / bf16-cast weights

    B = 64  # matches the PyTorch batch_size; exercises the two-step grid path
    x = jax.random.normal(k_x, (B, IN_FEATS), dtype=jnp.float32)

    out = jax.block_until_ready(net_forward(x, prep))
    ref = jax.block_until_ready(ref_forward(x, params))

    assert out.shape == (B, OUT), out.shape
    np.testing.assert_allclose(np.asarray(out), np.asarray(ref), rtol=1e-4, atol=1e-4)

    print("KERNEL_OK")
</pallas_src>

<mosaic_0001>
module attributes {stable_mosaic.version = 11 : i64} {
  func.func @net_kernel(%arg0: i32, %arg1: memref<32x3197xf32, #tpu.memory_space<vmem>>, %arg2: memref<3200x128xbf16, #tpu.memory_space<vmem>>, %arg3: memref<1x128xf32, #tpu.memory_space<vmem>>, %arg4: memref<64x64xf32, #tpu.memory_space<vmem>>, %arg5: memref<1x64xf32, #tpu.memory_space<vmem>>, %arg6: memref<32x2xf32, #tpu.memory_space<vmem>>, %arg7: memref<1x2xf32, #tpu.memory_space<vmem>>, %arg8: memref<32x2xf32, #tpu.memory_space<vmem>>, %arg9: memref<32x3200xbf16, #tpu.memory_space<vmem>>) attributes {dimension_semantics = [#tpu.dimension_semantics<parallel>], iteration_bounds = array<i64: 2>, scalar_prefetch = 0 : i64, scratch_operands = 1 : i64, tpu.core_type = #tpu.core_type<tc>, window_params = [{transform_indices = @transform_0, window_bounds = array<i64: 32, 3197>}, {pipeline_mode = #tpu.pipeline_mode<synchronous>, transform_indices = @transform_1, window_bounds = array<i64: 3200, 128>}, {pipeline_mode = #tpu.pipeline_mode<synchronous>, transform_indices = @transform_2, window_bounds = array<i64: 1, 128>}, {pipeline_mode = #tpu.pipeline_mode<synchronous>, transform_indices = @transform_3, window_bounds = array<i64: 64, 64>}, {pipeline_mode = #tpu.pipeline_mode<synchronous>, transform_indices = @transform_4, window_bounds = array<i64: 1, 64>}, {pipeline_mode = #tpu.pipeline_mode<synchronous>, transform_indices = @transform_5, window_bounds = array<i64: 32, 2>}, {pipeline_mode = #tpu.pipeline_mode<synchronous>, transform_indices = @transform_6, window_bounds = array<i64: 1, 2>}, {transform_indices = @transform_7, window_bounds = array<i64: 32, 2>}]} {
    %cst = arith.constant 0.000000e+00 : bf16
    %0 = vector.broadcast %cst : bf16 to vector<32x128xbf16>
    %c0 = arith.constant 0 : index
    %c3072 = arith.constant 3072 : index
    %1 = vector.load %arg9[%c0, %c3072] : memref<32x3200xbf16, #tpu.memory_space<vmem>>, vector<32x128xbf16>
    tpu.vector_store %arg9[%c0, %c3072], %0 {strides = array<i32>} : memref<32x3200xbf16, #tpu.memory_space<vmem>>, vector<32x128xbf16>,
    %c0_0 = arith.constant 0 : index
    %c0_1 = arith.constant 0 : index
    %2 = vector.load %arg1[%c0_0, %c0_1] : memref<32x3197xf32, #tpu.memory_space<vmem>>, vector<32x3197xf32>
    %3 = arith.truncf %2 : vector<32x3197xf32> to vector<32x3197xbf16>
    %c0_2 = arith.constant 0 : index
    %c0_3 = arith.constant 0 : index
    %4 = vector.load %arg9[%c0_2, %c0_3] : memref<32x3200xbf16, #tpu.memory_space<vmem>>, vector<32x3197xbf16>
    tpu.vector_store %arg9[%c0_2, %c0_3], %3 {strides = array<i32>} : memref<32x3200xbf16, #tpu.memory_space<vmem>>, vector<32x3197xbf16>,
    %c0_4 = arith.constant 0 : index
    %c0_5 = arith.constant 0 : index
    %5 = vector.load %arg9[%c0_4, %c0_5] : memref<32x3200xbf16, #tpu.memory_space<vmem>>, vector<32x3200xbf16>
    %c0_6 = arith.constant 0 : index
    %c0_7 = arith.constant 0 : index
    %6 = vector.load %arg2[%c0_6, %c0_7] : memref<3200x128xbf16, #tpu.memory_space<vmem>>, vector<3200x128xbf16>
    %cst_8 = arith.constant dense<0.000000e+00> : vector<32x128xf32>
    %7 = tpu.matmul %5, %6, %cst_8 {dimension_numbers = #tpu.dot_dimension_numbers<[1], [0], [0], [1], [0, 0, 1, 1], [], []>} : vector<32x3200xbf16>, vector<3200x128xbf16>, vector<32x128xf32> -> vector<32x128xf32>
    %c0_9 = arith.constant 0 : index
    %c0_10 = arith.constant 0 : index
    %8 = vector.load %arg3[%c0_9, %c0_10] : memref<1x128xf32, #tpu.memory_space<vmem>>, vector<1x128xf32>
    %9 = vector.broadcast %8 : vector<1x128xf32> to vector<32x128xf32>
    %10 = arith.addf %7, %9 : vector<32x128xf32>
    %11 = vector.extract_strided_slice %10 {offsets = [0, 0], sizes = [32, 64], strides = [1, 1]} : vector<32x128xf32> to vector<32x64xf32>
    %12 = vector.extract_strided_slice %10 {offsets = [0, 64], sizes = [32, 64], strides = [1, 1]} : vector<32x128xf32> to vector<32x64xf32>
    %13 = arith.maximumf %11, %12 : vector<32x64xf32>
    %cst_11 = arith.constant 1.000000e+00 : f32
    %14 = vector.broadcast %cst_11 : f32 to vector<32x64xf32>
    %15 = arith.cmpf ogt, %13, %14 : vector<32x64xf32>
    %16 = arith.extui %15 : vector<32x64xi1> to vector<32x64xi32>
    %17 = arith.sitofp %16 : vector<32x64xi32> to vector<32x64xf32>
    %c0_12 = arith.constant 0 : index
    %c0_13 = arith.constant 0 : index
    %18 = vector.load %arg4[%c0_12, %c0_13] : memref<64x64xf32, #tpu.memory_space<vmem>>, vector<64x64xf32>
    %cst_14 = arith.constant dense<0.000000e+00> : vector<32x64xf32>
    %19 = tpu.matmul %17, %18, %cst_14 {dimension_numbers = #tpu.dot_dimension_numbers<[1], [0], [0], [1], [0, 0, 1, 1], [], []>} : vector<32x64xf32>, vector<64x64xf32>, vector<32x64xf32> -> vector<32x64xf32>
    %c0_15 = arith.constant 0 : index
    %c0_16 = arith.constant 0 : index
    %20 = vector.load %arg5[%c0_15, %c0_16] : memref<1x64xf32, #tpu.memory_space<vmem>>, vector<1x64xf32>
    %21 = vector.broadcast %20 : vector<1x64xf32> to vector<32x64xf32>
    %22 = arith.addf %19, %21 : vector<32x64xf32>
    %23 = vector.extract_strided_slice %22 {offsets = [0, 0], sizes = [32, 32], strides = [1, 1]} : vector<32x64xf32> to vector<32x32xf32>
    %24 = vector.extract_strided_slice %22 {offsets = [0, 32], sizes = [32, 32], strides = [1, 1]} : vector<32x64xf32> to vector<32x32xf32>
    %25 = arith.maximumf %23, %24 : vector<32x32xf32>
    %cst_17 = arith.constant 1.000000e+00 : f32
    %26 = vector.broadcast %cst_17 : f32 to vector<32x32xf32>
    %27 = arith.cmpf ogt, %25, %26 : vector<32x32xf32>
    %28 = arith.extui %27 : vector<32x32xi1> to vector<32x32xi32>
    %29 = arith.sitofp %28 : vector<32x32xi32> to vector<32x32xf32>
    %c0_18 = arith.constant 0 : index
    %c0_19 = arith.constant 0 : index
    %30 = vector.load %arg6[%c0_18, %c0_19] : memref<32x2xf32, #tpu.memory_space<vmem>>, vector<32x2xf32>
    %cst_20 = arith.constant dense<0.000000e+00> : vector<32x2xf32>
    %31 = tpu.matmul %29, %30, %cst_20 {dimension_numbers = #tpu.dot_dimension_numbers<[1], [0], [0], [1], [0, 0, 1, 1], [], []>} : vector<32x32xf32>, vector<32x2xf32>, vector<32x2xf32> -> vector<32x2xf32>
    %c0_21 = arith.constant 0 : index
    %c0_22 = arith.constant 0 : index
    %32 = vector.load %arg7[%c0_21, %c0_22] : memref<1x2xf32, #tpu.memory_space<vmem>>, vector<1x2xf32>
    %33 = vector.broadcast %32 : vector<1x2xf32> to vector<32x2xf32>
    %34 = arith.addf %31, %33 : vector<32x2xf32>
    %c0_23 = arith.constant 0 : index
    %c0_24 = arith.constant 0 : index
    %35 = vector.load %arg8[%c0_23, %c0_24] : memref<32x2xf32, #tpu.memory_space<vmem>>, vector<32x2xf32>
    tpu.vector_store %arg8[%c0_23, %c0_24], %34 {strides = array<i32>} : memref<32x2xf32, #tpu.memory_space<vmem>>, vector<32x2xf32>,
    return
  }
  func.func @transform_0(%arg0: i32) -> (i32, i32) {
    %c0_i32 = arith.constant 0 : i32
    %c0_i32_0 = arith.constant 0 : i32
    return %arg0, %c0_i32 : i32, i32
  }
  func.func @transform_1(%arg0: i32) -> (i32, i32) {
    %c0_i32 = arith.constant 0 : i32
    %c0_i32_0 = arith.constant 0 : i32
    %c0_i32_1 = arith.constant 0 : i32
    return %c0_i32, %c0_i32_0 : i32, i32
  }
  func.func @transform_2(%arg0: i32) -> (i32, i32) {
    %c0_i32 = arith.constant 0 : i32
    %c0_i32_0 = arith.constant 0 : i32
    %c0_i32_1 = arith.constant 0 : i32
    return %c0_i32, %c0_i32_0 : i32, i32
  }
  func.func @transform_3(%arg0: i32) -> (i32, i32) {
    %c0_i32 = arith.constant 0 : i32
    %c0_i32_0 = arith.constant 0 : i32
    %c0_i32_1 = arith.constant 0 : i32
    return %c0_i32, %c0_i32_0 : i32, i32
  }
  func.func @transform_4(%arg0: i32) -> (i32, i32) {
    %c0_i32 = arith.constant 0 : i32
    %c0_i32_0 = arith.constant 0 : i32
    %c0_i32_1 = arith.constant 0 : i32
    return %c0_i32, %c0_i32_0 : i32, i32
  }
  func.func @transform_5(%arg0: i32) -> (i32, i32) {
    %c0_i32 = arith.constant 0 : i32
    %c0_i32_0 = arith.constant 0 : i32
    %c0_i32_1 = arith.constant 0 : i32
    return %c0_i32, %c0_i32_0 : i32, i32
  }
  func.func @transform_6(%arg0: i32) -> (i32, i32) {
    %c0_i32 = arith.constant 0 : i32
    %c0_i32_0 = arith.constant 0 : i32
    %c0_i32_1 = arith.constant 0 : i32
    return %c0_i32, %c0_i32_0 : i32, i32
  }
  func.func @transform_7(%arg0: i32) -> (i32, i32) {
    %c0_i32 = arith.constant 0 : i32
    %c0_i32_0 = arith.constant 0 : i32
    return %arg0, %c0_i32 : i32, i32
  }
}

</mosaic_0001>

<bundles_post_ra>
// kernel: net_forward.1
= control target key start
LH: loop header
LB: loop body
LE: loop exit
PB: predicated region body
PF: predicated region fallthrough
CT: control target
= control target key end

     0   :  { %12 = vsyncpa [#allocation4], 0  ;;  %s5034_s0 = inlined_call_operand.hbm [shape: f32[64,3197], index: 0, kind: input, shape index: {}]   ;;  %s5035_s1 = inlined_call_operand.hbm [shape: bf16[3200,128], index: 1, kind: input, shape index: {}]   ;;  %s5036_s2 = inlined_call_operand.vmem [shape: f32[1,128], index: 2, kind: input, shape index: {}]   ;;  %s5037_s3 = inlined_call_operand.hbm [shape: f32[64,64], index: 3, kind: input, shape index: {}]   ;;  %s5038_s4 = inlined_call_operand.vmem [shape: f32[1,64], index: 4, kind: input, shape index: {}]   ;;  %s5039_s5 = inlined_call_operand.vmem [shape: f32[32,2], index: 5, kind: input, shape index: {}]   ;;  %s5040_s6 = inlined_call_operand.vmem [shape: f32[1,2], index: 6, kind: input, shape index: {}]   ;;  %s5041_s7 = inlined_call_operand.vmem [shape: f32[64,2], index: 7, kind: output, shape index: {}]  }
   0x1   :  { %14 = vsyncpa [#allocation4 + $0x1], 0 }
   0x2   :  { %15 = vsyncpa [#allocation6], 0  ;;  %s4749_s24 = smov 0   ;;  %s4751_s25 = smov 0  }
   0x3   :  { %s4753_s26 = smov 0   ;;  %s4755_s27 = smov 0  }
   0x4 LB: > { %s5042_s28 = sadd.s32 4294967295, %s4695_s27   ;;  %p41_p0 = scmp.ne.s32.totalorder %s4687_s25, %s4683_s24  ;;  %s4695_s27 = sphi %s4755_s27, %s5051_s27   ;;  %s4691_s26 = sphi %s4753_s26, %s5050_s26   ;;  %s4687_s25 = sphi %s4751_s25, %s5049_s25   ;;  %s4683_s24 = sphi %s4749_s24, %s5048_s24  }
   0x5   : > { %p4771_p1 = scmp.eq.s32.totalorder %s5042_s28, 0  ;;  %p3191_p2 = scmp.ge.s32.totalorder %s4695_s27, 1 }
   0x6   : > { %p204_p3 = scmp.lt.s32.totalorder %s4695_s27, 3  ;;  %s215_s10 = sshll.u32 %s5035_s1, 4  ;;  %s216_s10 = int_to_ptr.hbm [resolvable:$true] %s215_s10 }
   0x7   : > { %p4779_p4 = por %p4771_p1, %p41_p0  ;;  %s4697_s12 = smov [#allocation5]  }
   0x8   : > { %p4786_p5 = pnand %p3191_p2, %p204_p3  ;;  %s217_s13 = sshll.u32 %s4697_s12, 4  ;;  %s218_s13 = int_to_ptr.vmem [resolvable:$true] %s217_s13 }
   0x9   : > { %s232_s16 = sshll.u32 %s5037_s3, 4  ;;  %s4698_s17 = smov 64   ;;  %s233_s16 = int_to_ptr.hbm [resolvable:$true] %s232_s16 }
   0xa   : > { %p4504_p6 = pneg %p4786_p5  ;;  %s4699_s18 = smov 4  }
   0xb   : > { %s4700_s19 = smov [#allocation7]   ;;  %s4701_s21 = smov 128  }
   0xc   : > { %p4505_p7 = pnand %p4504_p6, %p4771_p1  ;;  %s234_s20 = sshll.u32 %s4700_s19, 4  ;;  %s235_s20 = int_to_ptr.vmem [resolvable:$true] %s234_s20 }
   0xd   : > { %s4702_s22 = smov 8   ;;  %s4798_s23 = sadd.s32 1, %s4695_s27  }
   0xe   : > { %4507 = dma.hbm_to_vmem [thread:$0]  (!%p4505_p7), %s216_s10, 25600, %s218_s13, [#allocation6], %s4698_s17, %s4698_s17, %s4699_s18  }
   0xf   : > { %4510 = dma.hbm_to_vmem [thread:$0]  (!%p4505_p7), %s233_s16, 1024, %s235_s20, [#allocation6], %s4701_s21, %s4701_s21, %s4702_s22  }
  0x10   : > { %s25_s24 = ssub.s32 %s4695_s27, %s4798_s23  ;;  %s28_s8 = sadd.s32 1, %s4691_s26 }
  0x11   : > { %p26_p8 = scmp.eq.s32.totalorder %s25_s24, 0  ;;  %p35_p9 = scmp.ne.s32.totalorder %s4691_s26, %s4687_s25 }
  0x12   : > { %p36_p10 = scmp.eq.s32.totalorder %s4695_s27, 0  ;;  %p4517_p12 = scmp.lt.s32.totalorder %s4695_s27, 2 }
  0x13   : > { %s4807_s9 = scalar_select %p26_p8, %s4691_s26, %s28_s8  }
  0x14   : > { %p37_p11 = por %p36_p10, %p35_p9  ;;  %s257_s10 = sand.u32 1, %s4691_s26  }
  0x15   : > { %s4492_s12 = smul.u32 800, %s4695_s27  ;;  %s258_s21 = scalar_lea.sflag [#allocation4], %s257_s10 }
  0x16   : > { %s4491_s13 = smul.u32 800, %s257_s10  ;;  %p4815_p13 = pnand %p4517_p12, %p37_p11 }
  0x17   : > { %s267_s17 = scalar_lea.hbm %s5034_s0, %s4492_s12  ;;  %s4634_s14 = scalar_lea.hbm %s5034_s0, 1600 }
  0x18   : > { %s268_s18 = sshll.u32 %s267_s17, 4  ;;  %s261_s19 = scalar_lea.vmem [#allocation3], %s4491_s13  ;;  %s269_s18 = int_to_ptr.hbm [resolvable:$true] %s268_s18 }
  0x19   : > { %s270_s20 = sshll.u32 %s261_s19, 4  ;;  %s4627_s22 = sshra.s32 %s269_s18, 4  ;;  %s271_s20 = int_to_ptr.vmem [resolvable:$true] %s270_s20  ;;  %s4628_s22 = int_to_ptr.hbm [resolvable:$true] %s4627_s22 }
  0x1a   : > { %s4629_s24 = scalar_lea.hbm %s4628_s22, 800  ;;  %p4631_p2 = pneg %p4815_p13 }
  0x1b   : > { %p4630_p0 = scmp.ne.s32.totalorder %s4628_s22, %s4629_s24  ;;  %p4635_p7 = scmp.lt.s32.totalorder %s4628_s22, %s5034_s0 }
  0x1c   : > { %p4636_p8 = scmp.lt.s32.totalorder %s4634_s14, %s4629_s24 }
  0x1d   : > { %p4632_p3 = pnand %p4631_p2, %p4630_p0 }
  0x1e   : > { %p4637_p9 = por %p4636_p8, %p4635_p7 }
  0x1f   : > { %p4633_p6 = pneg %p4632_p3 }
  0x21   : > { %p4638_p10 = pnand %p4637_p9, %p4633_p6 }
  0x23   : > { %4641 = shalt.err (!%p4638_p10)
}
  0x24   : > { %s4703_s10 = smov 3200   ;;  %s4704_s13 = smov 200  }
  0x25   : > { %4514 = dma.hbm_to_vmem [thread:$0]  (!%p4815_p13), %s269_s18, 12800, %s271_s20, %s258_s21, %s4703_s10, %s4703_s10, %s4704_s13  }
  0x26   : > { %282 = sbr.rel (%p4786_p5) target bundleno = 923 (0x39b), region = 48  ;;  %s284_s17 = sand.u32 (!%p4786_p5), 1, %s4687_s25  }
  0x27   : > { %s4493_s19 = smul.u32 (!%p4786_p5), 800, %s284_s17  ;;  %s285_s8 = scalar_lea.sflag (!%p4786_p5), [#allocation4], %s284_s17 }
  0x29   : > { %s4832_s12 = scalar_lea.vmem (!%p4786_p5), [#allocation3], %s4493_s19 }
  0x2b   : > { %4674 = dma.done.wait (%p4779_p4), %s285_s8, 12800  }
  0x2c   : > { %4676 = vsyncadd (%p4779_p4), %s285_s8, 4294954496 }
  0x2d   : > { %4678 = dma.done.wait (%p4771_p1), [#allocation6], 26624  }
  0x2e   : > { %4680 = vsyncadd (%p4771_p1), [#allocation6], 4294940672  ;;  %v4278_v0 = vld [vmem:[#allocation5 + $0x38] sm:$0xff]  ;;  %v4277_v4 = vld [vmem:[#allocation5 + $0x30] sm:$0xff]  ;;  %vm506_vm0 = vcmask 1018880   ;;  %s4706_s30 = smov 64  }
  0x2f   : > { %v4294_v1 = vld [vmem:[#allocation5 + $0xb8] sm:$0xff]  ;;  %2455 = vmatpush.bf16.msra.mxu0 %v4278_v0  ;;  %v4293_v5 = vld [vmem:[#allocation5 + $0xb0] sm:$0xff]  ;;  %v4276_v8 = vld [vmem:[#allocation5 + $0x28] sm:$0xff]  ;;  %vm2974_vm1 = vcmask 523264   ;;  %s4708_s24 = smov 96   ;;  %vm3056_vm6 = vcmask 261120  }
  0x30   : > { %v4302_v2 = vld [vmem:[#allocation5 + $0xf8] sm:$0xff]  ;;  %2493 = vmatpush.bf16.msra.mxu2 %v4294_v1  ;;  %v4301_v6 = vld [vmem:[#allocation5 + $0xf0] sm:$0xff]  ;;  %v4292_v9 = vld [vmem:[#allocation5 + $0xa8] sm:$0xff]  ;;  %s5047_s17 = sadd.s32 4294967295, %s4695_s27   ;;  %vm3098_vm11 = vcmask 15360  }
  0x31   : > { %v4286_v3 = vld [vmem:[#allocation5 + $0x78] sm:$0xff]  ;;  %2512 = vmatpush.bf16.msra.mxu3 %v4302_v2  ;;  %v4285_v7 = vld [vmem:[#allocation5 + $0x70] sm:$0xff]  ;;  %v4300_v10 = vld [vmem:[#allocation5 + $0xe8] sm:$0xff]  ;;  %s3201_s19 = sshll.u32 %s5047_s17, 2 }
  0x32   : > { %2474 = vmatpush.bf16.msra.mxu1 %v4286_v3  ;;  %v4284_v11 = vld [vmem:[#allocation5 + $0x68] sm:$0xff]  ;;  %v4275_v12 = vld [vmem:[#allocation5 + $0x20] sm:$0xff]  ;;  %v368_v19 = vld [vmem:[%s4832_s12 + $0xd0] sm:$0xff]  ;;  %p332_p1 = scmp.lt.s32.totalorder %s3201_s19, 7 }
  0x33   : > { %2456 = vmatpush.bf16.msra.mxu0 %v4277_v4  ;;  %v4291_v13 = vld [vmem:[#allocation5 + $0xa0] sm:$0xff]  ;;  %v343_v17 = vld [vmem:[%s4832_s12 + $0x8] sm:$0xff]  ;;  %v344_v22 = vld [vmem:[%s4832_s12 + $0x10] sm:$0xff] }
  0x34   : > { %2494 = vmatpush.bf16.msra.mxu2 %v4293_v5  ;;  %v4299_v14 = vld [vmem:[#allocation5 + $0xe0] sm:$0xff]  ;;  %v367_v18 = vld [vmem:[%s4832_s12 + $0xc8] sm:$0xff]  ;;  %v345_v23 = vld [vmem:[%s4832_s12 + $0x18] sm:$0xff]  ;;  %s5053_s19 = smov (!%p332_p1, %s3201_s19), 7 }
  0x35   : > { %2513 = vmatpush.bf16.msra.mxu3 %v4301_v6  ;;  %v4283_v15 = vld [vmem:[#allocation5 + $0x60] sm:$0xff]  ;;  %v455_v21 = vpack.c.bf16 %v368_v19, %v367_v18  ;;  %v369_v24 = vld [vmem:[%s4832_s12 + $0xd8] sm:$0xff]  ;;  %v443_v26 = vpack.c.bf16 %v345_v23, %v344_v22  ;;  %v4273_v32 = vld [vmem:[#allocation5 + $0x10] sm:$0xff]  ;;  %s3202_s8 = sshll.u32 %s5053_s19, 3 }
  0x36   : > { %2475 = vmatpush.bf16.msra.mxu1 %v4285_v7  ;;  %v342_v16 = vld [vmem:[%s4832_s12] sm:$0xff]  ;;  %v4274_v27 = vld [vmem:[#allocation5 + $0x18] sm:$0xff]  ;;  %v4289_v33 = vld [vmem:[#allocation5 + $0x90] sm:$0xff]  ;;  %s335_s11 = scalar_lea.vmem %s5041_s7, %s3202_s8 }
  0x37   : > { %2457 = vmatpush.bf16.msra.mxu0 %v4276_v8  ;;  %v442_v20 = vpack.c.bf16 %v343_v17, %v342_v16  ;;  %v370_v25 = vld [vmem:[%s4832_s12 + $0xe0] sm:$0xff]  ;;  %v4290_v28 = vld [vmem:[#allocation5 + $0x98] sm:$0xff]  ;;  %508 = vst [vmem:[#allocation2 + $0x64] sm:$0xff] %v455_v21  ;;  %v4297_v34 = vld [vmem:[#allocation5 + $0xd0] sm:$0xff] }
  0x38   : > { %2495 = vmatpush.bf16.msra.mxu2 %v4292_v9  ;;  %v456_v29 = vpack.c.bf16 %v370_v25, %v369_v24  ;;  %v4298_v30 = vld [vmem:[#allocation5 + $0xd8] sm:$0xff]  ;;  %495 = vst [vmem:[#allocation2 + $0x8] sm:$0xff] %v443_v26  ;;  %v4281_v35 = vld [vmem:[#allocation5 + $0x50] sm:$0xff]  ;;  %v418_v39 = vld [vmem:[%s4832_s12 + $0x260] sm:$0xff] }
  0x39   : > { %2514 = vmatpush.bf16.msra.mxu3 %v4300_v10  ;;  %494 = vst [vmem:[#allocation2] sm:$0xff] %v442_v20  ;;  %v4282_v31 = vld [vmem:[#allocation5 + $0x58] sm:$0xff]  ;;  %v392_v36 = vld [vmem:[%s4832_s12 + $0x190] sm:$0xff]  ;;  %v394_v42 = vld [vmem:[%s4832_s12 + $0x1a0] sm:$0xff] }
  0x3a   : > { %2476 = vmatpush.bf16.msra.mxu1 %v4284_v11  ;;  %509 = vst [vmem:[#allocation2 + $0x6c] sm:$0xff] %v456_v29  ;;  %v393_v37 = vld [vmem:[%s4832_s12 + $0x198] sm:$0xff]  ;;  %v395_v43 = vld [vmem:[%s4832_s12 + $0x1a8] sm:$0xff]  ;;  %v420_v45 = vld [vmem:[%s4832_s12 + $0x270] sm:$0xff] }
  0x3b   : > { %2458 = vmatpush.bf16.msra.mxu0 %v4275_v12  ;;  %v417_v38 = vld [vmem:[%s4832_s12 + $0x258] sm:$0xff]  ;;  %v468_v40 = vpack.c.bf16 %v393_v37, %v392_v36  ;;  %v419_v44 = vld [vmem:[%s4832_s12 + $0x268] sm:$0xff]  ;;  %v469_v46 = vpack.c.bf16 %v395_v43, %v394_v42  ;;  %v4271_v52 = vld [vmem:[#allocation5] sm:$0xff] }
  0x3c   : > { %2496 = vmatpush.bf16.msra.mxu2 %v4291_v13  ;;  %v481_v41 = vpack.c.bf16 %v418_v39, %v417_v38  ;;  %v4272_v47 = vld [vmem:[#allocation5 + $0x8] sm:$0xff]  ;;  %v482_v49 = vpack.c.bf16 %v420_v45, %v419_v44  ;;  %v4287_v53 = vld [vmem:[#allocation5 + $0x80] sm:$0xff]  ;;  %v4310_v0 = vld [vmem:[#allocation5 + $0x138] sm:$0xff] }
  0x3d   : > { %2515 = vmatpush.bf16.msra.mxu3 %v4299_v14  ;;  %v4288_v48 = vld [vmem:[#allocation5 + $0x88] sm:$0xff]  ;;  %521 = vst [vmem:[#allocation2 + $0xc8] sm:$0xff] %v468_v40  ;;  %v4295_v54 = vld [vmem:[#allocation5 + $0xc0] sm:$0xff]  ;;  %v4326_v1 = vld [vmem:[#allocation5 + $0x1b8] sm:$0xff] }
  0x3e   : > { %2477 = vmatpush.bf16.msra.mxu1 %v4283_v15  ;;  %v4296_v50 = vld [vmem:[#allocation5 + $0xc8] sm:$0xff]  ;;  %534 = vst [vmem:[#allocation2 + $0x12c] sm:$0xff] %v481_v41  ;;  %v4279_v55 = vld [vmem:[#allocation5 + $0x40] sm:$0xff]  ;;  %v4233_v58 = vld [vmem:[#allocation2 + $0x60] sm:$0xf0] }
  0x3f   : > { %2459 = vmatpush.bf16.msra.mxu0 %v4274_v27  ;;  %v4280_v51 = vld [vmem:[#allocation5 + $0x48] sm:$0xff]  ;;  %522 = vst [vmem:[#allocation2 + $0xd0] sm:$0xff] %v469_v46  ;;  %v3213_v59 = vld [vmem:[#allocation2 + $0x8] sm:$0xf]  ;;  %v4222_v61 = vld [vmem:[#allocation2 + $0xc] sm:$0xf] }
  0x40   : > { %2497 = vmatpush.bf16.msra.mxu2 %v4290_v28  ;;  %v3205_v56 = vld [vmem:[#allocation2] sm:$0xf]  ;;  %v4221_v57 = vld [vmem:[#allocation2 + $0x4] sm:$0xf]  ;;  %535 = vst [vmem:[#allocation2 + $0x134] sm:$0xff] %v482_v49  ;;  %v346_v4 = vld [vmem:[%s4832_s12 + $0x20] sm:$0xff] }
  0x41   : > { %2516 = vmatpush.bf16.msra.mxu3 %v4298_v30  ;;  %v4234_v60 = vld [vmem:[#allocation2 + $0x68] sm:$0xf0]  ;;  %v3215_v62 = vld [vmem:[#allocation2 + $0x6c] sm:$0xf0]  ;;  %v3207_v63 = vld [vmem:[#allocation2 + $0x64] sm:$0xf0]  ;;  %v3206_v2 = vor.u32 %v4233_v58, %v3205_v56 }
  0x42   : > { %2478 = vmatpush.bf16.msra.mxu1 %v4282_v31  ;;  %v3214_v3 = vor.u32 %v4234_v60, %v3213_v59  ;;  %v3218_v5 = vor.u32 %v4222_v61, %v3215_v62  ;;  %v3210_v6 = vor.u32 %v4221_v57, %v3207_v63  ;;  %v347_v7 = vld [vmem:[%s4832_s12 + $0x28] sm:$0xff]  ;;  %v4334_v8 = vld [vmem:[#allocation5 + $0x1f8] sm:$0xff]  ;;  %v4309_v11 = vld [vmem:[#allocation5 + $0x130] sm:$0xff] }
  0x43   : > { %2460 = vmatpush.bf16.msra.mxu0 %v4273_v32  ;;  %v4318_v9 = vld [vmem:[#allocation5 + $0x178] sm:$0xff]  ;;  %v444_v10 = vpack.c.bf16 %v347_v7, %v346_v4  ;;  %v4325_v12 = vld [vmem:[#allocation5 + $0x1b0] sm:$0xff]  ;;  %v371_v13 = vld [vmem:[%s4832_s12 + $0xe8] sm:$0xff] }
  0x44   : > { %2498 = vmatpush.bf16.msra.mxu2 %v4289_v33  ;;  %v372_v14 = vld [vmem:[%s4832_s12 + $0xf0] sm:$0xff]  ;;  %v349_v16 = vld [vmem:[%s4832_s12 + $0x38] sm:$0xff]  ;;  %v374_v19 = vld [vmem:[%s4832_s12 + $0x100] sm:$0xff] }
  0x45   : > { %2517 = vmatpush.bf16.msra.mxu3 %v4297_v34  ;;  %496 = vst [vmem:[#allocation2 + $0x10] sm:$0xff] %v444_v10  ;;  %v348_v15 = vld [vmem:[%s4832_s12 + $0x30] sm:$0xff]  ;;  %v457_v17 = vpack.c.bf16 %v372_v14, %v371_v13  ;;  %v373_v18 = vld [vmem:[%s4832_s12 + $0xf8] sm:$0xff]  ;;  %v4308_v24 = vld [vmem:[#allocation5 + $0x128] sm:$0xff] }
  0x46   : > { %2479 = vmatpush.bf16.msra.mxu1 %v4281_v35  ;;  %v445_v20 = vpack.c.bf16 %v349_v16, %v348_v15  ;;  %v4333_v21 = vld [vmem:[#allocation5 + $0x1f0] sm:$0xff]  ;;  %v458_v23 = vpack.c.bf16 %v374_v19, %v373_v18  ;;  %v4324_v25 = vld [vmem:[#allocation5 + $0x1a8] sm:$0xff]  ;;  %v397_v29 = vld [vmem:[%s4832_s12 + $0x1b8] sm:$0xff] }
  0x47   : > { %2461 = vmatpush.bf16.msra.mxu0 %v4272_v47  ;;  %v4317_v22 = vld [vmem:[#allocation5 + $0x170] sm:$0xff]  ;;  %510 = vst [vmem:[#allocation2 + $0x74] sm:$0xff] %v457_v17  ;;  %v4332_v26 = vld [vmem:[#allocation5 + $0x1e8] sm:$0xff]  ;;  %v421_v30 = vld [vmem:[%s4832_s12 + $0x278] sm:$0xff] }
  0x48   : > { %2499 = vmatpush.bf16.msra.mxu2 %v4288_v48  ;;  %v4316_v27 = vld [vmem:[#allocation5 + $0x168] sm:$0xff]  ;;  %497 = vst [vmem:[#allocation2 + $0x18] sm:$0xff] %v445_v20  ;;  %v396_v28 = vld [vmem:[%s4832_s12 + $0x1b0] sm:$0xff]  ;;  %v422_v31 = vld [vmem:[%s4832_s12 + $0x280] sm:$0xff] }
  0x49   : > { %2518 = vmatpush.bf16.msra.mxu3 %v4296_v50  ;;  %511 = vst [vmem:[#allocation2 + $0x7c] sm:$0xff] %v458_v23  ;;  %v4307_v32 = vld [vmem:[#allocation5 + $0x120] sm:$0xff]  ;;  %v470_v34 = vpack.c.bf16 %v397_v29, %v396_v28  ;;  %v483_v35 = vpack.c.bf16 %v422_v31, %v421_v30  ;;  %v3305_v37 = vld [vmem:[#allocation2 + $0xc8] sm:$0xf]  ;;  %v4258_v38 = vld [vmem:[#allocation2 + $0x128] sm:$0xf0] }
  0x4a   : > { %2480 = vmatpush.bf16.msra.mxu1 %v4280_v51  ;;  %v4323_v33 = vld [vmem:[#allocation5 + $0x1a0] sm:$0xff]  ;;  %v4246_v43 = vld [vmem:[#allocation2 + $0xcc] sm:$0xf]  ;;  %v399_v44 = vld [vmem:[%s4832_s12 + $0x1c8] sm:$0xff] }
  0x4b   : > { %2462 = vmatpush.bf16.msra.mxu0 %v4271_v52  ;;  %v398_v36 = vld [vmem:[%s4832_s12 + $0x1c0] sm:$0xff]  ;;  %523 = vst [vmem:[#allocation2 + $0xd8] sm:$0xff] %v470_v34  ;;  %v423_v45 = vld [vmem:[%s4832_s12 + $0x288] sm:$0xff]  ;;  %v424_v46 = vld [vmem:[%s4832_s12 + $0x290] sm:$0xff] }
  0x4c   : > { %2500 = vmatpush.bf16.msra.mxu2 %v4287_v53  ;;  %v3313_v39 = vld [vmem:[#allocation2 + $0xd0] sm:$0xf]  ;;  %v4259_v42 = vld [vmem:[#allocation2 + $0x130] sm:$0xf0]  ;;  %536 = vst [vmem:[#allocation2 + $0x13c] sm:$0xff] %v483_v35  ;;  %v471_v47 = vpack.c.bf16 %v399_v44, %v398_v36  ;;  %v484_v51 = vpack.c.bf16 %v424_v46, %v423_v45  ;;  %v4306_v52 = vld [vmem:[#allocation5 + $0x118] sm:$0xff] }
  0x4d   : > { %2519 = vmatpush.bf16.msra.mxu3 %v4295_v54  ;;  %v4331_v40 = vld [vmem:[#allocation5 + $0x1e0] sm:$0xff]  ;;  %v3315_v49 = vld [vmem:[#allocation2 + $0x134] sm:$0xf0]  ;;  %v4322_v53 = vld [vmem:[#allocation5 + $0x198] sm:$0xff]  ;;  %v3306_v54 = vor.u32 %v4258_v38, %v3305_v37 }
  0x4e   : > { %2481 = vmatpush.bf16.msra.mxu1 %v4279_v55  ;;  %2463 = vmatmul.bf16.vlgmr.msra.gmra.mxu0 %v3206_v2  ;;  %v4315_v41 = vld [vmem:[#allocation5 + $0x160] sm:$0xff]  ;;  %524 = vst [vmem:[#allocation2 + $0xe0] sm:$0xff] %v471_v47  ;;  %v3314_v55 = vor.u32 %v4259_v42, %v3313_v39  ;;  %v4330_v58 = vld [vmem:[#allocation5 + $0x1d8] sm:$0xff]  ;;  %v4305_v60 = vld [vmem:[#allocation5 + $0x110] sm:$0xff] }
  0x4f   : > { %2531 = vmatpush.bf16.msrb.mxu0 %v4310_v0  ;;  %2501 = vmatmul.bf16.vlgmr.msra.gmra.mxu2 %v3214_v3  ;;  %v4247_v48 = vld [vmem:[#allocation2 + $0xd4] sm:$0xf]  ;;  %v3307_v50 = vld [vmem:[#allocation2 + $0x12c] sm:$0xf0]  ;;  %537 = vst [vmem:[#allocation2 + $0x144] sm:$0xff] %v484_v51  ;;  %v4314_v59 = vld [vmem:[#allocation5 + $0x158] sm:$0xff] }
  0x50   : > { %2569 = vmatpush.bf16.msrb.mxu2 %v4326_v1  ;;  %2520 = vmatmul.bf16.vlgmr.msra.gmra.mxu3 %v3218_v5  ;;  %v3318_v56 = vor.u32 %v4247_v48, %v3315_v49  ;;  %v3310_v57 = vor.u32 %v4246_v43, %v3307_v50  ;;  %v4321_v61 = vld [vmem:[#allocation5 + $0x190] sm:$0xff]  ;;  %v4304_v0 = vld [vmem:[#allocation5 + $0x108] sm:$0xff]  ;;  %v4303_v4 = vld [vmem:[#allocation5 + $0x100] sm:$0xff] }
  0x51   : > { %2482 = vmatmul.bf16.vlgmr.msra.gmra.mxu1 %v3210_v6  ;;  %2588 = vmatpush.bf16.msrb.mxu3 %v4334_v8  ;;  %v4329_v62 = vld [vmem:[#allocation5 + $0x1d0] sm:$0xff]  ;;  %v4320_v1 = vld [vmem:[#allocation5 + $0x188] sm:$0xff]  ;;  %v4319_v5 = vld [vmem:[#allocation5 + $0x180] sm:$0xff] }
  0x52   : > { %2550 = vmatpush.bf16.msrb.mxu1 %v4318_v9  ;;  %v4313_v63 = vld [vmem:[#allocation5 + $0x150] sm:$0xff]  ;;  %v4328_v2 = vld [vmem:[#allocation5 + $0x1c8] sm:$0xff]  ;;  %v350_v6 = vld [vmem:[%s4832_s12 + $0x40] sm:$0xff] }
  0x53   : > { %2532 = vmatpush.bf16.msrb.mxu0 %v4309_v11  ;;  %v4312_v3 = vld [vmem:[#allocation5 + $0x148] sm:$0xff]  ;;  %v4342_v8 = vld [vmem:[#allocation5 + $0x238] sm:$0xff]  ;;  %v4235_v13 = vld [vmem:[#allocation2 + $0x70] sm:$0xf0] }
  0x54   : > { %2570 = vmatpush.bf16.msrb.mxu2 %v4325_v12  ;;  %v351_v7 = vld [vmem:[%s4832_s12 + $0x48] sm:$0xff]  ;;  %v4358_v9 = vld [vmem:[#allocation5 + $0x2b8] sm:$0xff]  ;;  %v3221_v12 = vld [vmem:[#allocation2 + $0x10] sm:$0xf] }
  0x55   : > { %2589 = vmatpush.bf16.msrb.mxu3 %v4333_v21  ;;  %v375_v10 = vld [vmem:[%s4832_s12 + $0x108] sm:$0xff]  ;;  %v446_v11 = vpack.c.bf16 %v351_v7, %v350_v6  ;;  %v376_v14 = vld [vmem:[%s4832_s12 + $0x110] sm:$0xff]  ;;  %v4327_v15 = vld [vmem:[#allocation5 + $0x1c0] sm:$0xff] }
  0x56   : > { %2551 = vmatpush.bf16.msrb.mxu1 %v4317_v22  ;;  %v4223_v16 = vld [vmem:[#allocation2 + $0x14] sm:$0xf]  ;;  %v3223_v17 = vld [vmem:[#allocation2 + $0x74] sm:$0xf0]  ;;  %v459_v18 = vpack.c.bf16 %v376_v14, %v375_v10  ;;  %v352_v19 = vld [vmem:[%s4832_s12 + $0x50] sm:$0xff] }
  0x57   : > { %2533 = vmatpush.bf16.msrb.mxu0 %v4308_v24  ;;  %498 = vst [vmem:[#allocation2 + $0x20] sm:$0xff] %v446_v11  ;;  %v353_v20 = vld [vmem:[%s4832_s12 + $0x58] sm:$0xff]  ;;  %v3229_v22 = vld [vmem:[#allocation2 + $0x18] sm:$0xf]  ;;  %v4236_v23 = vld [vmem:[#allocation2 + $0x78] sm:$0xf0]  ;;  %v3226_v35 = vor.u32 %v4223_v16, %v3223_v17 }
  0x58   : > { %2571 = vmatpush.bf16.msrb.mxu2 %v4324_v25  ;;  %v377_v21 = vld [vmem:[%s4832_s12 + $0x118] sm:$0xff]  ;;  %v378_v24 = vld [vmem:[%s4832_s12 + $0x120] sm:$0xff]  ;;  %v447_v25 = vpack.c.bf16 %v353_v20, %v352_v19  ;;  %v3231_v28 = vld [vmem:[#allocation2 + $0x7c] sm:$0xf0]  ;;  %512 = vst [vmem:[#allocation2 + $0x84] sm:$0xff] %v459_v18 }
  0x59   : > { %2590 = vmatpush.bf16.msrb.mxu3 %v4332_v26  ;;  %v4311_v26 = vld [vmem:[#allocation5 + $0x140] sm:$0xff]  ;;  %v460_v29 = vpack.c.bf16 %v378_v24, %v377_v21  ;;  %v4366_v30 = vld [vmem:[#allocation5 + $0x2f8] sm:$0xff]  ;;  %v4341_v36 = vld [vmem:[#allocation5 + $0x230] sm:$0xff] }
  0x5a   : > { %2552 = vmatpush.bf16.msrb.mxu1 %v4316_v27  ;;  %v4224_v27 = vld [vmem:[#allocation2 + $0x1c] sm:$0xf]  ;;  %v4350_v31 = vld [vmem:[#allocation5 + $0x278] sm:$0xff]  ;;  %499 = vst [vmem:[#allocation2 + $0x28] sm:$0xff] %v447_v25  ;;  %v4357_v37 = vld [vmem:[#allocation5 + $0x2b0] sm:$0xff] }
  0x5b   : > { %2534 = vmatpush.bf16.msrb.mxu0 %v4307_v32  ;;  %v3222_v32 = vor.u32 %v4235_v13, %v3221_v12  ;;  %513 = vst [vmem:[#allocation2 + $0x8c] sm:$0xff] %v460_v29  ;;  %v3234_v34 = vor.u32 %v4224_v27, %v3231_v28  ;;  %v4365_v38 = vld [vmem:[#allocation5 + $0x2f0] sm:$0xff]  ;;  %v4364_v42 = vld [vmem:[#allocation5 + $0x2e8] sm:$0xff]  ;;  %v4339_v44 = vld [vmem:[#allocation5 + $0x220] sm:$0xff] }
  0x5c   : > { %2572 = vmatpush.bf16.msrb.mxu2 %v4323_v33  ;;  %v3230_v33 = vor.u32 %v4236_v23, %v3229_v22  ;;  %v4349_v39 = vld [vmem:[#allocation5 + $0x270] sm:$0xff]  ;;  %v4348_v43 = vld [vmem:[#allocation5 + $0x268] sm:$0xff]  ;;  %v4355_v45 = vld [vmem:[#allocation5 + $0x2a0] sm:$0xff] }
  0x5d   : > { %2591 = vmatpush.bf16.msrb.mxu3 %v4331_v40  ;;  %v4340_v40 = vld [vmem:[#allocation5 + $0x228] sm:$0xff]  ;;  %v400_v46 = vld [vmem:[%s4832_s12 + $0x1d0] sm:$0xff]  ;;  %v401_v47 = vld [vmem:[%s4832_s12 + $0x1d8] sm:$0xff] }
  0x5e   : > { %2553 = vmatpush.bf16.msrb.mxu1 %v4315_v41  ;;  %2468 = vmatmul.bf16.gmra.mxu0 %v3306_v54  ;;  %v4356_v41 = vld [vmem:[#allocation5 + $0x2a8] sm:$0xff]  ;;  %v4363_v48 = vld [vmem:[#allocation5 + $0x2e0] sm:$0xff]  ;;  %v425_v50 = vld [vmem:[%s4832_s12 + $0x298] sm:$0xff]  ;;  %v472_v51 = vpack.c.bf16 %v401_v47, %v400_v46 }
  0x5f   : > { %2535 = vmatpush.bf16.msrb.mxu0 %v4306_v52  ;;  %2506 = vmatmul.bf16.gmra.mxu2 %v3314_v55  ;;  %v4347_v49 = vld [vmem:[#allocation5 + $0x260] sm:$0xff]  ;;  %v3321_v52 = vld [vmem:[#allocation2 + $0xd8] sm:$0xf]  ;;  %v4338_v55 = vld [vmem:[#allocation5 + $0x218] sm:$0xff] }
  0x60   : > { %2573 = vmatpush.bf16.msrb.mxu2 %v4322_v53  ;;  %2525 = vmatmul.bf16.gmra.mxu3 %v3318_v56  ;;  %v4260_v53 = vld [vmem:[#allocation2 + $0x138] sm:$0xf0]  ;;  %v426_v54 = vld [vmem:[%s4832_s12 + $0x2a0] sm:$0xff]  ;;  %525 = vst [vmem:[#allocation2 + $0xe8] sm:$0xff] %v472_v51  ;;  %v4362_v6 = vld [vmem:[#allocation5 + $0x2d8] sm:$0xff] }
  0x61   : > { %2487 = vmatmul.bf16.gmra.mxu1 %v3310_v57  ;;  %2592 = vmatpush.bf16.msrb.mxu3 %v4330_v58  ;;  %v4248_v56 = vld [vmem:[#allocation2 + $0xdc] sm:$0xf]  ;;  %v3323_v57 = vld [vmem:[#allocation2 + $0x13c] sm:$0xf0]  ;;  %v485_v58 = vpack.c.bf16 %v426_v54, %v425_v50  ;;  %v4346_v7 = vld [vmem:[#allocation5 + $0x258] sm:$0xff] }
  0x62   : > { %2554 = vmatpush.bf16.msrb.mxu1 %v4314_v59  ;;  %v402_v59 = vld [vmem:[%s4832_s12 + $0x1e0] sm:$0xff]  ;;  %v3326_v11 = vor.u32 %v4248_v56, %v3323_v57  ;;  %v4337_v12 = vld [vmem:[#allocation5 + $0x210] sm:$0xff]  ;;  %v4336_v16 = vld [vmem:[#allocation5 + $0x208] sm:$0xff] }
  0x63   : > { %2536 = vmatpush.bf16.msrb.mxu0 %v4305_v60  ;;  %v403_v60 = vld [vmem:[%s4832_s12 + $0x1e8] sm:$0xff]  ;;  %538 = vst [vmem:[#allocation2 + $0x14c] sm:$0xff] %v485_v58  ;;  %v4353_v13 = vld [vmem:[#allocation5 + $0x290] sm:$0xff]  ;;  %v4335_v20 = vld [vmem:[#allocation5 + $0x200] sm:$0xff] }
  0x64   : > { %2574 = vmatpush.bf16.msrb.mxu2 %v4321_v61  ;;  %v427_v61 = vld [vmem:[%s4832_s12 + $0x2a8] sm:$0xff]  ;;  %v4361_v14 = vld [vmem:[#allocation5 + $0x2d0] sm:$0xff]  ;;  %v4351_v21 = vld [vmem:[#allocation5 + $0x280] sm:$0xff] }
  0x65   : > { %2593 = vmatpush.bf16.msrb.mxu3 %v4329_v62  ;;  %v3329_v62 = vld [vmem:[#allocation2 + $0xe0] sm:$0xf]  ;;  %v4352_v17 = vld [vmem:[#allocation5 + $0x288] sm:$0xff]  ;;  %v4359_v22 = vld [vmem:[#allocation5 + $0x2c0] sm:$0xff] }
  0x66   : > { %2555 = vmatpush.bf16.msrb.mxu1 %v4313_v63  ;;  %v4261_v63 = vld [vmem:[#allocation2 + $0x140] sm:$0xf0]  ;;  %v4360_v18 = vld [vmem:[#allocation5 + $0x2c8] sm:$0xff]  ;;  %v4343_v23 = vld [vmem:[#allocation5 + $0x240] sm:$0xff] }
  0x67   : > { %2537 = vmatpush.bf16.msrb.mxu0 %v4304_v0  ;;  %v428_v0 = vld [vmem:[%s4832_s12 + $0x2b0] sm:$0xff]  ;;  %v4344_v19 = vld [vmem:[#allocation5 + $0x248] sm:$0xff]  ;;  %v354_v24 = vld [vmem:[%s4832_s12 + $0x60] sm:$0xff] }
  0x68   : > { %2575 = vmatpush.bf16.msrb.mxu2 %v4320_v1  ;;  %v473_v1 = vpack.c.bf16 %v403_v60, %v402_v59  ;;  %v355_v25 = vld [vmem:[%s4832_s12 + $0x68] sm:$0xff]  ;;  %v4390_v27 = vld [vmem:[#allocation5 + $0x3b8] sm:$0xff]  ;;  %v3247_v46 = vld [vmem:[#allocation2 + $0x8c] sm:$0xf0] }
  0x69   : > { %2594 = vmatpush.bf16.msrb.mxu3 %v4328_v2  ;;  %v4249_v2 = vld [vmem:[#allocation2 + $0xe4] sm:$0xf]  ;;  %v379_v28 = vld [vmem:[%s4832_s12 + $0x128] sm:$0xff]  ;;  %v448_v29 = vpack.c.bf16 %v355_v25, %v354_v24  ;;  %v4371_v60 = vld [vmem:[#allocation5 + $0x320] sm:$0xff] }
  0x6a   : > { %2556 = vmatpush.bf16.msrb.mxu1 %v4312_v3  ;;  %v3331_v3 = vld [vmem:[#allocation2 + $0x144] sm:$0xf0]  ;;  %526 = vst [vmem:[#allocation2 + $0xf0] sm:$0xff] %v473_v1  ;;  %v4397_v54 = vld [vmem:[#allocation5 + $0x3f0] sm:$0xff]  ;;  %v4372_v56 = vld [vmem:[#allocation5 + $0x328] sm:$0xff] }
  0x6b   : > { %2538 = vmatpush.bf16.msrb.mxu0 %v4303_v4  ;;  %v4354_v4 = vld [vmem:[#allocation5 + $0x298] sm:$0xff]  ;;  %v3334_v10 = vor.u32 %v4249_v2, %v3331_v3  ;;  %500 = vst [vmem:[#allocation2 + $0x30] sm:$0xff] %v448_v29  ;;  %v4388_v57 = vld [vmem:[#allocation5 + $0x3a8] sm:$0xff]  ;;  %v4379_v1 = vld [vmem:[#allocation5 + $0x360] sm:$0xff] }
  0x6c   : > { %2576 = vmatpush.bf16.msrb.mxu2 %v4319_v5  ;;  %v486_v5 = vpack.c.bf16 %v428_v0, %v427_v61  ;;  %v4396_v58 = vld [vmem:[#allocation5 + $0x3e8] sm:$0xff]  ;;  %v4387_v61 = vld [vmem:[#allocation5 + $0x3a0] sm:$0xff]  ;;  %v429_v2 = vld [vmem:[%s4832_s12 + $0x2b8] sm:$0xff] }
  0x6d   : > { %2595 = vmatpush.bf16.msrb.mxu3 %v4327_v15  ;;  %v4345_v15 = vld [vmem:[#allocation5 + $0x250] sm:$0xff]  ;;  %v4380_v59 = vld [vmem:[#allocation5 + $0x368] sm:$0xff]  ;;  %v4395_v0 = vld [vmem:[#allocation5 + $0x3e0] sm:$0xff] }
  0x6e   : > { %2557 = vmatpush.bf16.msrb.mxu1 %v4311_v26  ;;  %2539 = vmatmul.bf16.vlgmr.msrb.gmra.mxu0 %v3222_v32  ;;  %539 = vst [vmem:[#allocation2 + $0x154] sm:$0xff] %v486_v5  ;;  %v4374_v26 = vld [vmem:[#allocation5 + $0x338] sm:$0xff]  ;;  %v4385_v29 = vld [vmem:[#allocation5 + $0x390] sm:$0xff] }
  0x6f   : > { %2607 = vmatpush.bf16.msra.mxu0 %v4342_v8  ;;  %2577 = vmatmul.bf16.vlgmr.msrb.gmra.mxu2 %v3230_v33  ;;  %v3322_v8 = vor.u32 %v4260_v53, %v3321_v52  ;;  %v3245_v32 = vld [vmem:[#allocation2 + $0x28] sm:$0xf]  ;;  %v4373_v52 = vld [vmem:[#allocation5 + $0x330] sm:$0xff]  ;;  %v4262_v5 = vld [vmem:[#allocation2 + $0x148] sm:$0xf0] }
  0x70   : > { %2645 = vmatpush.bf16.msra.mxu2 %v4358_v9  ;;  %2596 = vmatmul.bf16.vlgmr.msrb.gmra.mxu3 %v3234_v34  ;;  %v3330_v9 = vor.u32 %v4261_v63, %v3329_v62  ;;  %v4398_v33 = vld [vmem:[#allocation5 + $0x3f8] sm:$0xff]  ;;  %v380_v34 = vld [vmem:[%s4832_s12 + $0x130] sm:$0xff] }
  0x71   : > { %2664 = vmatpush.bf16.msra.mxu3 %v4366_v30  ;;  %2558 = vmatmul.bf16.vlgmr.msrb.gmra.mxu1 %v3226_v35  ;;  %v3237_v30 = vld [vmem:[#allocation2 + $0x20] sm:$0xf]  ;;  %v4225_v35 = vld [vmem:[#allocation2 + $0x24] sm:$0xf]  ;;  %v405_v63 = vld [vmem:[%s4832_s12 + $0x1f8] sm:$0xff] }
  0x72   : > { %2626 = vmatpush.bf16.msra.mxu1 %v4350_v31  ;;  %v4237_v31 = vld [vmem:[#allocation2 + $0x80] sm:$0xf0] }
  0x73   : > { %2608 = vmatpush.bf16.msra.mxu0 %v4341_v36  ;;  %v3239_v36 = vld [vmem:[#allocation2 + $0x84] sm:$0xf0]  ;;  %v4389_v53 = vld [vmem:[#allocation5 + $0x3b0] sm:$0xff] }
  0x74   : > { %2646 = vmatpush.bf16.msra.mxu2 %v4357_v37  ;;  %v461_v37 = vpack.c.bf16 %v380_v34, %v379_v28  ;;  %v3242_v51 = vor.u32 %v4225_v35, %v3239_v36  ;;  %v404_v62 = vld [vmem:[%s4832_s12 + $0x1f0] sm:$0xff]  ;;  %v4392_v34 = vld [vmem:[#allocation5 + $0x3c8] sm:$0xff]  ;;  %v4367_v36 = vld [vmem:[#allocation5 + $0x300] sm:$0xff] }
  0x75   : > { %2665 = vmatpush.bf16.msra.mxu3 %v4365_v38  ;;  %v356_v38 = vld [vmem:[%s4832_s12 + $0x70] sm:$0xff]  ;;  %v474_v3 = vpack.c.bf16 %v405_v63, %v404_v62  ;;  %v4376_v35 = vld [vmem:[#allocation5 + $0x348] sm:$0xff] }
  0x76   : > { %2627 = vmatpush.bf16.msra.mxu1 %v4349_v39  ;;  %v357_v39 = vld [vmem:[%s4832_s12 + $0x78] sm:$0xff]  ;;  %514 = vst [vmem:[#allocation2 + $0x94] sm:$0xff] %v461_v37  ;;  %v4369_v28 = vld [vmem:[#allocation5 + $0x310] sm:$0xff]  ;;  %v4383_v37 = vld [vmem:[#allocation5 + $0x380] sm:$0xff] }
  0x77   : > { %2609 = vmatpush.bf16.msra.mxu0 %v4340_v40  ;;  %v381_v40 = vld [vmem:[%s4832_s12 + $0x138] sm:$0xff]  ;;  %527 = vst [vmem:[#allocation2 + $0xf8] sm:$0xff] %v474_v3 }
  0x78   : > { %2647 = vmatpush.bf16.msra.mxu2 %v4356_v41  ;;  %v4238_v41 = vld [vmem:[#allocation2 + $0x88] sm:$0xf0] }
  0x79   : > { %2666 = vmatpush.bf16.msra.mxu3 %v4364_v42  ;;  %v4382_v42 = vld [vmem:[#allocation5 + $0x378] sm:$0xff] }
  0x7a   : > { %2628 = vmatpush.bf16.msra.mxu1 %v4348_v43  ;;  %v382_v43 = vld [vmem:[%s4832_s12 + $0x140] sm:$0xff] }
  0x7b   : > { %2610 = vmatpush.bf16.msra.mxu0 %v4339_v44  ;;  %v449_v44 = vpack.c.bf16 %v357_v39, %v356_v38  ;;  %v462_v47 = vpack.c.bf16 %v382_v43, %v381_v40  ;;  %v4391_v38 = vld [vmem:[#allocation5 + $0x3c0] sm:$0xff]  ;;  %v4422_v43 = vld [vmem:[#allocation5 + $0x4b8] sm:$0xff] }
  0x7c   : > { %2648 = vmatpush.bf16.msra.mxu2 %v4355_v45  ;;  %v4226_v45 = vld [vmem:[#allocation2 + $0x2c] sm:$0xf]  ;;  %v4375_v39 = vld [vmem:[#allocation5 + $0x340] sm:$0xff] }
  0x7d   : > { %2667 = vmatpush.bf16.msra.mxu3 %v4363_v48  ;;  %501 = vst [vmem:[#allocation2 + $0x38] sm:$0xff] %v449_v44  ;;  %v3238_v48 = vor.u32 %v4237_v31, %v3237_v30  ;;  %v3250_v50 = vor.u32 %v4226_v45, %v3247_v46  ;;  %v4393_v30 = vld [vmem:[#allocation5 + $0x3d0] sm:$0xff]  ;;  %v358_v40 = vld [vmem:[%s4832_s12 + $0x80] sm:$0xff]  ;;  %v383_v44 = vld [vmem:[%s4832_s12 + $0x148] sm:$0xff] }
  0x7e   : > { %2629 = vmatpush.bf16.msra.mxu1 %v4347_v49  ;;  %2544 = vmatmul.bf16.gmra.mxu0 %v3322_v8  ;;  %v3246_v49 = vor.u32 %v4238_v41, %v3245_v32  ;;  %515 = vst [vmem:[#allocation2 + $0x9c] sm:$0xff] %v462_v47  ;;  %v4250_v8 = vld [vmem:[#allocation2 + $0xec] sm:$0xf]  ;;  %v4377_v31 = vld [vmem:[#allocation5 + $0x350] sm:$0xff]  ;;  %v4368_v32 = vld [vmem:[#allocation5 + $0x308] sm:$0xff] }
  0x7f   : > { %2611 = vmatpush.bf16.msra.mxu0 %v4338_v55  ;;  %2582 = vmatmul.bf16.gmra.mxu2 %v3330_v9  ;;  %v4381_v55 = vld [vmem:[#allocation5 + $0x370] sm:$0xff]  ;;  %v3339_v9 = vld [vmem:[#allocation2 + $0x14c] sm:$0xf0]  ;;  %v359_v41 = vld [vmem:[%s4832_s12 + $0x88] sm:$0xff] }
  0x80   : > { %2649 = vmatpush.bf16.msra.mxu2 %v4354_v4  ;;  %2601 = vmatmul.bf16.gmra.mxu3 %v3334_v10  ;;  %v3337_v4 = vld [vmem:[#allocation2 + $0xe8] sm:$0xf]  ;;  %v450_v45 = vpack.c.bf16 %v359_v41, %v358_v40  ;;  %v3253_v46 = vld [vmem:[#allocation2 + $0x30] sm:$0xf]  ;;  %v4239_v47 = vld [vmem:[#allocation2 + $0x90] sm:$0xf0] }
  0x81   : > { %2668 = vmatpush.bf16.msra.mxu3 %v4362_v6  ;;  %2563 = vmatmul.bf16.gmra.mxu1 %v3326_v11  ;;  %v430_v6 = vld [vmem:[%s4832_s12 + $0x2c0] sm:$0xff]  ;;  %v3338_v24 = vor.u32 %v4262_v5, %v3337_v4  ;;  %v4405_v4 = vld [vmem:[#allocation5 + $0x430] sm:$0xff] }
  0x82   : > { %2630 = vmatpush.bf16.msra.mxu1 %v4346_v7  ;;  %v4370_v7 = vld [vmem:[#allocation5 + $0x318] sm:$0xff]  ;;  %v487_v10 = vpack.c.bf16 %v430_v6, %v429_v2  ;;  %v406_v11 = vld [vmem:[%s4832_s12 + $0x200] sm:$0xff]  ;;  %502 = vst [vmem:[#allocation2 + $0x40] sm:$0xff] %v450_v45  ;;  %v4421_v5 = vld [vmem:[#allocation5 + $0x4b0] sm:$0xff] }
  0x83   : > { %2612 = vmatpush.bf16.msra.mxu0 %v4337_v12  ;;  %v407_v12 = vld [vmem:[%s4832_s12 + $0x208] sm:$0xff]  ;;  %v4429_v6 = vld [vmem:[#allocation5 + $0x4f0] sm:$0xff] }
  0x84   : > { %2650 = vmatpush.bf16.msra.mxu2 %v4353_v13  ;;  %v431_v13 = vld [vmem:[%s4832_s12 + $0x2c8] sm:$0xff]  ;;  %540 = vst [vmem:[#allocation2 + $0x15c] sm:$0xff] %v487_v10  ;;  %v4417_v45 = vld [vmem:[#allocation5 + $0x490] sm:$0xff] }
  0x85   : > { %2669 = vmatpush.bf16.msra.mxu3 %v4361_v14  ;;  %v3345_v14 = vld [vmem:[#allocation2 + $0xf0] sm:$0xf]  ;;  %v3263_v62 = vld [vmem:[#allocation2 + $0x9c] sm:$0xf0]  ;;  %v4428_v10 = vld [vmem:[#allocation5 + $0x4e8] sm:$0xff] }
  0x86   : > { %2631 = vmatpush.bf16.msra.mxu1 %v4345_v15  ;;  %v4263_v15 = vld [vmem:[#allocation2 + $0x150] sm:$0xf0] }
  0x87   : > { %2613 = vmatpush.bf16.msra.mxu0 %v4336_v16  ;;  %v432_v16 = vld [vmem:[%s4832_s12 + $0x2d0] sm:$0xff]  ;;  %v3346_v25 = vor.u32 %v4263_v15, %v3345_v14  ;;  %v4427_v14 = vld [vmem:[#allocation5 + $0x4e0] sm:$0xff] }
  0x88   : > { %2651 = vmatpush.bf16.msra.mxu2 %v4352_v17  ;;  %v475_v17 = vpack.c.bf16 %v407_v12, %v406_v11  ;;  %v4412_v11 = vld [vmem:[#allocation5 + $0x468] sm:$0xff]  ;;  %v4403_v12 = vld [vmem:[#allocation5 + $0x420] sm:$0xff]  ;;  %v408_v15 = vld [vmem:[%s4832_s12 + $0x210] sm:$0xff] }
  0x89   : > { %2670 = vmatpush.bf16.msra.mxu3 %v4360_v18  ;;  %v4251_v18 = vld [vmem:[#allocation2 + $0xf4] sm:$0xf] }
  0x8a   : > { %2632 = vmatpush.bf16.msra.mxu1 %v4344_v19  ;;  %v3347_v19 = vld [vmem:[#allocation2 + $0x154] sm:$0xf0]  ;;  %528 = vst [vmem:[#allocation2 + $0x100] sm:$0xff] %v475_v17  ;;  %v433_v17 = vld [vmem:[%s4832_s12 + $0x2d8] sm:$0xff] }
  0x8b   : > { %2614 = vmatpush.bf16.msra.mxu0 %v4335_v20  ;;  %v4386_v20 = vld [vmem:[#allocation5 + $0x398] sm:$0xff] }
  0x8c   : > { %2652 = vmatpush.bf16.msra.mxu2 %v4351_v21  ;;  %v488_v21 = vpack.c.bf16 %v432_v16, %v431_v13  ;;  %v4419_v13 = vld [vmem:[#allocation5 + $0x4a0] sm:$0xff]  ;;  %v409_v16 = vld [vmem:[%s4832_s12 + $0x218] sm:$0xff] }
  0x8d   : > { %2671 = vmatpush.bf16.msra.mxu3 %v4359_v22  ;;  %v4394_v22 = vld [vmem:[#allocation5 + $0x3d8] sm:$0xff] }
  0x8e   : > { %2633 = vmatpush.bf16.msra.mxu1 %v4343_v23  ;;  %2615 = vmatmul.bf16.vlgmr.msra.gmra.mxu0 %v3238_v48  ;;  %v4378_v23 = vld [vmem:[#allocation5 + $0x358] sm:$0xff]  ;;  %541 = vst [vmem:[#allocation2 + $0x164] sm:$0xff] %v488_v21  ;;  %v3261_v48 = vld [vmem:[#allocation2 + $0x38] sm:$0xf]  ;;  %v410_v21 = vld [vmem:[%s4832_s12 + $0x220] sm:$0xff] }
  0x8f   : > { %2683 = vmatpush.bf16.msrb.mxu0 %v4374_v26  ;;  %2653 = vmatmul.bf16.vlgmr.msra.gmra.mxu2 %v3246_v49  ;;  %v3350_v26 = vor.u32 %v4251_v18, %v3347_v19  ;;  %v4430_v49 = vld [vmem:[#allocation5 + $0x4f8] sm:$0xff]  ;;  %v4411_v18 = vld [vmem:[#allocation5 + $0x460] sm:$0xff] }
  0x90   : > { %2721 = vmatpush.bf16.msrb.mxu2 %v4390_v27  ;;  %2672 = vmatmul.bf16.vlgmr.msra.gmra.mxu3 %v3250_v50  ;;  %v3342_v27 = vor.u32 %v4250_v8, %v3339_v9  ;;  %v384_v50 = vld [vmem:[%s4832_s12 + $0x150] sm:$0xff]  ;;  %v4404_v8 = vld [vmem:[#allocation5 + $0x428] sm:$0xff]  ;;  %v434_v19 = vld [vmem:[%s4832_s12 + $0x2e0] sm:$0xff] }
  0x91   : > { %2740 = vmatpush.bf16.msrb.mxu3 %v4398_v33  ;;  %2634 = vmatmul.bf16.vlgmr.msra.gmra.mxu1 %v3242_v51  ;;  %v4384_v33 = vld [vmem:[#allocation5 + $0x388] sm:$0xff]  ;;  %v4227_v51 = vld [vmem:[#allocation2 + $0x34] sm:$0xf] }
  0x92   : > { %2702 = vmatpush.bf16.msrb.mxu1 %v4382_v42  ;;  %v4406_v42 = vld [vmem:[#allocation5 + $0x438] sm:$0xff]  ;;  %v4420_v9 = vld [vmem:[#allocation5 + $0x4a8] sm:$0xff] }
  0x93   : > { %2684 = vmatpush.bf16.msrb.mxu0 %v4373_v52  ;;  %v3255_v52 = vld [vmem:[#allocation2 + $0x94] sm:$0xf0] }
  0x94   : > { %2722 = vmatpush.bf16.msrb.mxu2 %v4389_v53  ;;  %v463_v53 = vpack.c.bf16 %v384_v50, %v383_v44  ;;  %v3258_v3 = vor.u32 %v4227_v51, %v3255_v52  ;;  %v4401_v44 = vld [vmem:[#allocation5 + $0x410] sm:$0xff]  ;;  %v4424_v50 = vld [vmem:[#allocation5 + $0x4c8] sm:$0xff]  ;;  %v4399_v52 = vld [vmem:[#allocation5 + $0x400] sm:$0xff] }
  0x95   : > { %2741 = vmatpush.bf16.msrb.mxu3 %v4397_v54  ;;  %v360_v54 = vld [vmem:[%s4832_s12 + $0x90] sm:$0xff]  ;;  %v4408_v51 = vld [vmem:[#allocation5 + $0x448] sm:$0xff] }
  0x96   : > { %2703 = vmatpush.bf16.msrb.mxu1 %v4381_v55  ;;  %v361_v55 = vld [vmem:[%s4832_s12 + $0x98] sm:$0xff]  ;;  %516 = vst [vmem:[#allocation2 + $0xa4] sm:$0xff] %v463_v53  ;;  %v4415_v53 = vld [vmem:[#allocation5 + $0x480] sm:$0xff] }
  0x97   : > { %2685 = vmatpush.bf16.msrb.mxu0 %v4372_v56  ;;  %v385_v56 = vld [vmem:[%s4832_s12 + $0x158] sm:$0xff] }
  0x98   : > { %2723 = vmatpush.bf16.msrb.mxu2 %v4388_v57  ;;  %v4240_v57 = vld [vmem:[#allocation2 + $0x98] sm:$0xf0] }
  0x99   : > { %2742 = vmatpush.bf16.msrb.mxu3 %v4396_v58  ;;  %v4414_v58 = vld [vmem:[#allocation5 + $0x478] sm:$0xff] }
  0x9a   : > { %2704 = vmatpush.bf16.msrb.mxu1 %v4380_v59  ;;  %v386_v59 = vld [vmem:[%s4832_s12 + $0x160] sm:$0xff] }
  0x9b   : > { %2686 = vmatpush.bf16.msrb.mxu0 %v4371_v60  ;;  %v451_v60 = vpack.c.bf16 %v361_v55, %v360_v54  ;;  %v464_v63 = vpack.c.bf16 %v386_v59, %v385_v56  ;;  %v4423_v54 = vld [vmem:[#allocation5 + $0x4c0] sm:$0xff]  ;;  %v4438_v59 = vld [vmem:[#allocation5 + $0x538] sm:$0xff] }
  0x9c   : > { %2724 = vmatpush.bf16.msrb.mxu2 %v4387_v61  ;;  %v4228_v61 = vld [vmem:[#allocation2 + $0x3c] sm:$0xf]  ;;  %v4407_v55 = vld [vmem:[#allocation5 + $0x440] sm:$0xff] }
  0x9d   : > { %2743 = vmatpush.bf16.msrb.mxu3 %v4395_v0  ;;  %503 = vst [vmem:[#allocation2 + $0x48] sm:$0xff] %v451_v60  ;;  %v3254_v0 = vor.u32 %v4239_v47, %v3253_v46  ;;  %v3266_v2 = vor.u32 %v4228_v61, %v3263_v62  ;;  %v4425_v46 = vld [vmem:[#allocation5 + $0x4d0] sm:$0xff]  ;;  %v362_v56 = vld [vmem:[%s4832_s12 + $0xa0] sm:$0xff]  ;;  %v4454_v60 = vld [vmem:[#allocation5 + $0x5b8] sm:$0xff] }
  0x9e   : > { %2705 = vmatpush.bf16.msrb.mxu1 %v4379_v1  ;;  %2620 = vmatmul.bf16.gmra.mxu0 %v3338_v24  ;;  %v3262_v1 = vor.u32 %v4240_v57, %v3261_v48  ;;  %517 = vst [vmem:[#allocation2 + $0xac] sm:$0xff] %v464_v63  ;;  %v489_v24 = vpack.c.bf16 %v434_v19, %v433_v17  ;;  %v4409_v47 = vld [vmem:[#allocation5 + $0x450] sm:$0xff]  ;;  %v4400_v48 = vld [vmem:[#allocation5 + $0x408] sm:$0xff] }
  0x9f   : > { %2687 = vmatpush.bf16.msrb.mxu0 %v4370_v7  ;;  %2658 = vmatmul.bf16.gmra.mxu2 %v3346_v25  ;;  %v4413_v7 = vld [vmem:[#allocation5 + $0x470] sm:$0xff]  ;;  %v411_v25 = vld [vmem:[%s4832_s12 + $0x228] sm:$0xff] }
  0xa0   : > { %2725 = vmatpush.bf16.msrb.mxu2 %v4386_v20  ;;  %2677 = vmatmul.bf16.gmra.mxu3 %v3350_v26  ;;  %v476_v20 = vpack.c.bf16 %v409_v16, %v408_v15  ;;  %v435_v26 = vld [vmem:[%s4832_s12 + $0x2e8] sm:$0xff]  ;;  %542 = vst [vmem:[#allocation2 + $0x16c] sm:$0xff] %v489_v24  ;;  %v388_v61 = vld [vmem:[%s4832_s12 + $0x170] sm:$0xff] }
  0xa1   : > { %2744 = vmatpush.bf16.msrb.mxu3 %v4394_v22  ;;  %2639 = vmatmul.bf16.gmra.mxu1 %v3342_v27  ;;  %v3353_v22 = vld [vmem:[#allocation2 + $0xf8] sm:$0xf]  ;;  %v436_v27 = vld [vmem:[%s4832_s12 + $0x2f0] sm:$0xff] }
  0xa2   : > { %2706 = vmatpush.bf16.msrb.mxu1 %v4378_v23  ;;  %v4264_v23 = vld [vmem:[#allocation2 + $0x158] sm:$0xf0]  ;;  %529 = vst [vmem:[#allocation2 + $0x108] sm:$0xff] %v476_v20  ;;  %v364_v63 = vld [vmem:[%s4832_s12 + $0xb0] sm:$0xff] }
  0xa3   : > { %2688 = vmatpush.bf16.msrb.mxu0 %v4369_v28  ;;  %v4252_v28 = vld [vmem:[#allocation2 + $0xfc] sm:$0xf]  ;;  %v3354_v40 = vor.u32 %v4264_v23, %v3353_v22  ;;  %v4437_v24 = vld [vmem:[#allocation5 + $0x530] sm:$0xff] }
  0xa4   : > { %2726 = vmatpush.bf16.msrb.mxu2 %v4385_v29  ;;  %v3355_v29 = vld [vmem:[#allocation2 + $0x15c] sm:$0xf0]  ;;  %v363_v57 = vld [vmem:[%s4832_s12 + $0xa8] sm:$0xff]  ;;  %v4230_v15 = vld [vmem:[#allocation2 + $0x4c] sm:$0xf] }
  0xa5   : > { %2745 = vmatpush.bf16.msrb.mxu3 %v4393_v30  ;;  %v477_v30 = vpack.c.bf16 %v411_v25, %v410_v21  ;;  %v452_v62 = vpack.c.bf16 %v363_v57, %v362_v56  ;;  %v3279_v16 = vld [vmem:[#allocation2 + $0xac] sm:$0xf0]  ;;  %v4453_v25 = vld [vmem:[#allocation5 + $0x5b0] sm:$0xff] }
  0xa6   : > { %2707 = vmatpush.bf16.msrb.mxu1 %v4377_v31  ;;  %v490_v31 = vpack.c.bf16 %v436_v27, %v435_v26  ;;  %v3282_v20 = vor.u32 %v4230_v15, %v3279_v16  ;;  %v4461_v26 = vld [vmem:[#allocation5 + $0x5f0] sm:$0xff] }
  0xa7   : > { %2689 = vmatpush.bf16.msrb.mxu0 %v4368_v32  ;;  %v3361_v32 = vld [vmem:[#allocation2 + $0x100] sm:$0xf]  ;;  %530 = vst [vmem:[#allocation2 + $0x110] sm:$0xff] %v477_v30  ;;  %v4452_v30 = vld [vmem:[#allocation5 + $0x5a8] sm:$0xff] }
  0xa8   : > { %2727 = vmatpush.bf16.msrb.mxu2 %v4384_v33  ;;  %v4265_v33 = vld [vmem:[#allocation2 + $0x160] sm:$0xf0]  ;;  %543 = vst [vmem:[#allocation2 + $0x174] sm:$0xff] %v490_v31 }
  0xa9   : > { %2746 = vmatpush.bf16.msrb.mxu3 %v4392_v34  ;;  %v4402_v34 = vld [vmem:[#allocation5 + $0x418] sm:$0xff]  ;;  %v3362_v41 = vor.u32 %v4265_v33, %v3361_v32  ;;  %504 = vst [vmem:[#allocation2 + $0x50] sm:$0xff] %v452_v62  ;;  %v4445_v27 = vld [vmem:[#allocation5 + $0x570] sm:$0xff]  ;;  %v4460_v32 = vld [vmem:[#allocation5 + $0x5e8] sm:$0xff] }
  0xaa   : > { %2708 = vmatpush.bf16.msrb.mxu1 %v4376_v35  ;;  %v4253_v35 = vld [vmem:[#allocation2 + $0x104] sm:$0xf]  ;;  %v4444_v33 = vld [vmem:[#allocation5 + $0x568] sm:$0xff]  ;;  %v4434_v62 = vld [vmem:[#allocation5 + $0x518] sm:$0xff] }
  0xab   : > { %2690 = vmatpush.bf16.msrb.mxu0 %v4367_v36  ;;  %v3363_v36 = vld [vmem:[#allocation2 + $0x164] sm:$0xf0]  ;;  %v4433_v16 = vld [vmem:[#allocation5 + $0x510] sm:$0xff] }
  0xac   : > { %2728 = vmatpush.bf16.msrb.mxu2 %v4383_v37  ;;  %v4418_v37 = vld [vmem:[#allocation5 + $0x498] sm:$0xff] }
  0xad   : > { %2747 = vmatpush.bf16.msrb.mxu3 %v4391_v38  ;;  %v4426_v38 = vld [vmem:[#allocation5 + $0x4d8] sm:$0xff] }
  0xae   : > { %2709 = vmatpush.bf16.msrb.mxu1 %v4375_v39  ;;  %2691 = vmatmul.bf16.vlgmr.msrb.gmra.mxu0 %v3254_v0  ;;  %v4410_v39 = vld [vmem:[#allocation5 + $0x458] sm:$0xff]  ;;  %v3269_v0 = vld [vmem:[#allocation2 + $0x40] sm:$0xf] }
  0xaf   : > { %2759 = vmatpush.bf16.msra.mxu0 %v4406_v42  ;;  %2729 = vmatmul.bf16.vlgmr.msrb.gmra.mxu2 %v3262_v1  ;;  %v3366_v42 = vor.u32 %v4253_v35, %v3363_v36  ;;  %v4241_v1 = vld [vmem:[#allocation2 + $0xa0] sm:$0xf0]  ;;  %v4435_v36 = vld [vmem:[#allocation5 + $0x520] sm:$0xff] }
  0xb0   : > { %2797 = vmatpush.bf16.msra.mxu2 %v4422_v43  ;;  %2748 = vmatmul.bf16.vlgmr.msrb.gmra.mxu3 %v3266_v2  ;;  %v3358_v43 = vor.u32 %v4252_v28, %v3355_v29  ;;  %v3270_v17 = vor.u32 %v4241_v1, %v3269_v0  ;;  %v4436_v29 = vld [vmem:[#allocation5 + $0x528] sm:$0xff]  ;;  %v4450_v0 = vld [vmem:[#allocation5 + $0x598] sm:$0xff] }
  0xb1   : > { %2816 = vmatpush.bf16.msra.mxu3 %v4430_v49  ;;  %2710 = vmatmul.bf16.vlgmr.msrb.gmra.mxu1 %v3258_v3  ;;  %v4416_v49 = vld [vmem:[#allocation5 + $0x488] sm:$0xff]  ;;  %v365_v3 = vld [vmem:[%s4832_s12 + $0xb8] sm:$0xff] }
  0xb2   : > { %2778 = vmatpush.bf16.msra.mxu1 %v4414_v58  ;;  %v387_v58 = vld [vmem:[%s4832_s12 + $0x168] sm:$0xff]  ;;  %v4254_v1 = vld [vmem:[#allocation2 + $0x10c] sm:$0xf] }
  0xb3   : > { %2760 = vmatpush.bf16.msra.mxu0 %v4405_v4  ;;  %v465_v2 = vpack.c.bf16 %v388_v61, %v387_v58  ;;  %v389_v4 = vld [vmem:[%s4832_s12 + $0x178] sm:$0xff]  ;;  %v3377_v58 = vld [vmem:[#allocation2 + $0x110] sm:$0xf]  ;;  %v3379_v61 = vld [vmem:[#allocation2 + $0x174] sm:$0xf0] }
  0xb4   : > { %2798 = vmatpush.bf16.msra.mxu2 %v4421_v5  ;;  %v390_v5 = vld [vmem:[%s4832_s12 + $0x180] sm:$0xff] }
  0xb5   : > { %2817 = vmatpush.bf16.msra.mxu3 %v4429_v6  ;;  %v4933_v6 = vld [vmem:[%s5036_s2] ss:$0 sm:$0xff]  ;;  %518 = vst [vmem:[#allocation2 + $0xb4] sm:$0xff] %v465_v2  ;;  %v3371_v2 = vld [vmem:[#allocation2 + $0x16c] sm:$0xf0] }
  0xb6   : > { %2779 = vmatpush.bf16.msra.mxu1 %v4413_v7  ;;  %v4462_v7 = vld [vmem:[#allocation5 + $0x5f8] sm:$0xff] }
  0xb7   : > { %2761 = vmatpush.bf16.msra.mxu0 %v4404_v8  ;;  %v4229_v8 = vld [vmem:[#allocation2 + $0x44] sm:$0xf] }
  0xb8   : > { %2799 = vmatpush.bf16.msra.mxu2 %v4420_v9  ;;  %v3271_v9 = vld [vmem:[#allocation2 + $0xa4] sm:$0xf0] }
  0xb9   : > { %2818 = vmatpush.bf16.msra.mxu3 %v4428_v10  ;;  %v453_v10 = vpack.c.bf16 %v365_v3, %v364_v63  ;;  %v3274_v21 = vor.u32 %v4229_v8, %v3271_v9 }
  0xba   : > { %2780 = vmatpush.bf16.msra.mxu1 %v4412_v11  ;;  %v466_v11 = vpack.c.bf16 %v390_v5, %v389_v4  ;;  %v4458_v4 = vld [vmem:[#allocation5 + $0x5d8] sm:$0xff] }
  0xbb   : > { %2762 = vmatpush.bf16.msra.mxu0 %v4403_v12  ;;  %v3277_v12 = vld [vmem:[#allocation2 + $0x48] sm:$0xf]  ;;  %505 = vst [vmem:[#allocation2 + $0x58] sm:$0xff] %v453_v10 }
  0xbc   : > { %2800 = vmatpush.bf16.msra.mxu2 %v4419_v13  ;;  %v4242_v13 = vld [vmem:[#allocation2 + $0xa8] sm:$0xf0]  ;;  %519 = vst [vmem:[#allocation2 + $0xbc] sm:$0xff] %v466_v11 }
  0xbd   : > { %2819 = vmatpush.bf16.msra.mxu3 %v4427_v14  ;;  %v4446_v14 = vld [vmem:[#allocation5 + $0x578] sm:$0xff] }
  0xbe   : > { %2781 = vmatpush.bf16.msra.mxu1 %v4411_v18  ;;  %2696 = vmatmul.bf16.gmra.mxu0 %v3354_v40  ;;  %v3278_v18 = vor.u32 %v4242_v13, %v3277_v12  ;;  %v4442_v5 = vld [vmem:[#allocation5 + $0x558] sm:$0xff]  ;;  %v3374_v13 = vor.u32 %v4254_v1, %v3371_v2 }
  0xbf   : > { %2763 = vmatpush.bf16.msra.mxu0 %v4402_v34  ;;  %2734 = vmatmul.bf16.gmra.mxu2 %v3362_v41  ;;  %v4459_v41 = vld [vmem:[#allocation5 + $0x5e0] sm:$0xff] }
  0xc0   : > { %2801 = vmatpush.bf16.msra.mxu2 %v4418_v37  ;;  %2753 = vmatmul.bf16.gmra.mxu3 %v3366_v42  ;;  %v4451_v37 = vld [vmem:[#allocation5 + $0x5a0] sm:$0xff]  ;;  %v437_v42 = vld [vmem:[%s4832_s12 + $0x2f8] sm:$0xff] }
  0xc1   : > { %2820 = vmatpush.bf16.msra.mxu3 %v4426_v38  ;;  %2715 = vmatmul.bf16.gmra.mxu1 %v3358_v43  ;;  %v412_v38 = vld [vmem:[%s4832_s12 + $0x230] sm:$0xff]  ;;  %v438_v43 = vld [vmem:[%s4832_s12 + $0x300] sm:$0xff] }
  0xc2   : > { %2782 = vmatpush.bf16.msra.mxu1 %v4410_v39  ;;  %v413_v39 = vld [vmem:[%s4832_s12 + $0x238] sm:$0xff] }
  0xc3   : > { %2764 = vmatpush.bf16.msra.mxu0 %v4401_v44  ;;  %v478_v44 = vpack.c.bf16 %v413_v39, %v412_v38  ;;  %v441_v38 = vld [vmem:[%s4832_s12 + $0x318] sm:$0xff]  ;;  %v4439_v39 = vld [vmem:[#allocation5 + $0x540] sm:$0xff] }
  0xc4   : > { %2802 = vmatpush.bf16.msra.mxu2 %v4417_v45  ;;  %v414_v45 = vld [vmem:[%s4832_s12 + $0x240] sm:$0xff] }
  0xc5   : > { %2821 = vmatpush.bf16.msra.mxu3 %v4425_v46  ;;  %531 = vst [vmem:[#allocation2 + $0x118] sm:$0xff] %v478_v44  ;;  %v3293_v44 = vld [vmem:[#allocation2 + $0x58] sm:$0xf] }
  0xc6   : > { %2783 = vmatpush.bf16.msra.mxu1 %v4409_v47 }
  0xc7   : > { %2765 = vmatpush.bf16.msra.mxu0 %v4400_v48 }
  0xc8   : > { %2803 = vmatpush.bf16.msra.mxu2 %v4416_v49  ;;  %v491_v49 = vpack.c.bf16 %v438_v43, %v437_v42  ;;  %v4470_v42 = vld [vmem:[#allocation5 + $0x638] sm:$0xff] }
  0xc9   : > { %2822 = vmatpush.bf16.msra.mxu3 %v4424_v50  ;;  %v415_v50 = vld [vmem:[%s4832_s12 + $0x248] sm:$0xff] }
  0xca   : > { %2784 = vmatpush.bf16.msra.mxu1 %v4408_v51  ;;  %v439_v51 = vld [vmem:[%s4832_s12 + $0x308] sm:$0xff]  ;;  %v479_v56 = vpack.c.bf16 %v415_v50, %v414_v45  ;;  %544 = vst [vmem:[#allocation2 + $0x17c] sm:$0xff] %v491_v49  ;;  %v4231_v45 = vld [vmem:[#allocation2 + $0x54] sm:$0xf]  ;;  %v493_v50 = vpack.c.bf16 %v441_v38, %v441_v38 }
  0xcb   : > { %2766 = vmatpush.bf16.msra.mxu0 %v4399_v52  ;;  %v2464_v19 = vpop.f32.mrf.mxu0  ;;  %v440_v52 = vld [vmem:[%s4832_s12 + $0x310] sm:$0xff]  ;;  %v4232_v49 = vld [vmem:[#allocation2 + $0x5c] sm:$0xf] }
  0xcc   : > { %2804 = vmatpush.bf16.msra.mxu2 %v4415_v53  ;;  %v2465_v22 = vadd.f32 %v4933_v6, %v2464_v19  ;;  %v4443_v53 = vld [vmem:[#allocation5 + $0x560] sm:$0xff]  ;;  %v492_v57 = vpack.c.bf16 %v440_v52, %v439_v51  ;;  %532 = vst [vmem:[#allocation2 + $0x120] sm:$0xff] %v479_v56  ;;  %v4441_v19 = vld [vmem:[#allocation5 + $0x550] sm:$0xff]  ;;  %v3287_v52 = vld [vmem:[#allocation2 + $0xb4] sm:$0xf0] }
  0xcd   : > { %2823 = vmatpush.bf16.msra.mxu3 %v4423_v54  ;;  %v3369_v54 = vld [vmem:[#allocation2 + $0x108] sm:$0xf]  ;;  %v3295_v51 = vld [vmem:[#allocation2 + $0xbc] sm:$0xf0] }
  0xce   : > { %2785 = vmatpush.bf16.msra.mxu1 %v4407_v55  ;;  %v2483_v23 = vpop.f32.mrf.mxu1  ;;  %2767 = vmatmul.bf16.vlgmr.msra.gmra.mxu0 %v3270_v17  ;;  %v4266_v55 = vld [vmem:[#allocation2 + $0x168] sm:$0xf0]  ;;  %545 = vst [vmem:[#allocation2 + $0x184] sm:$0xff] %v492_v57  ;;  %v4449_v17 = vld [vmem:[#allocation5 + $0x590] sm:$0xff] }
  0xcf   : > { %2835 = vmatpush.bf16.msrb.mxu0 %v4438_v59  ;;  %2805 = vmatmul.bf16.vlgmr.msra.gmra.mxu2 %v3278_v18  ;;  %v2484_v28 = vadd.f32 %v2483_v23, %v2465_v22  ;;  %v4255_v59 = vld [vmem:[#allocation2 + $0x114] sm:$0xf]  ;;  %v3370_v9 = vor.u32 %v4266_v55, %v3369_v54  ;;  %v4457_v18 = vld [vmem:[#allocation5 + $0x5d0] sm:$0xff]  ;;  %v4456_v23 = vld [vmem:[#allocation5 + $0x5c8] sm:$0xff] }
  0xd0   : > { %2873 = vmatpush.bf16.msrb.mxu2 %v4454_v60  ;;  %2824 = vmatmul.bf16.vlgmr.msra.gmra.mxu3 %v3282_v20  ;;  %v4267_v60 = vld [vmem:[#allocation2 + $0x170] sm:$0xf0]  ;;  %v3382_v12 = vor.u32 %v4255_v59, %v3379_v61  ;;  %v4432_v20 = vld [vmem:[#allocation5 + $0x508] sm:$0xff]  ;;  %v3298_v59 = vor.u32 %v4232_v49, %v3295_v51 }
  0xd1   : > { %2892 = vmatpush.bf16.msrb.mxu3 %v4462_v7  ;;  %2786 = vmatmul.bf16.vlgmr.msra.gmra.mxu1 %v3274_v21  ;;  %v3378_v10 = vor.u32 %v4267_v60, %v3377_v58  ;;  %v4448_v21 = vld [vmem:[#allocation5 + $0x588] sm:$0xff]  ;;  %v3290_v60 = vor.u32 %v4231_v45, %v3287_v52  ;;  %v4463_v45 = vld [vmem:[#allocation5 + $0x600] sm:$0xff] }
  0xd2   : > { %2854 = vmatpush.bf16.msrb.mxu1 %v4446_v14  ;;  %v2502_v31 = vpop.f32.mrf.mxu2 }
  0xd3   : > { %2836 = vmatpush.bf16.msrb.mxu0 %v4437_v24  ;;  %v2503_v34 = vadd.f32 %v2502_v31, %v2484_v28  ;;  %v2521_v35 = vpop.f32.mrf.mxu3  ;;  %v2466_v40 = vpop.f32.mrf.mxu0  ;;  %v4440_v24 = vld [vmem:[#allocation5 + $0x548] sm:$0xff] }
  0xd4   : > { %2874 = vmatpush.bf16.msrb.mxu2 %v4453_v25  ;;  %v2467_v47 = vadd.f32 %v4933_v6, %v2466_v40  ;;  %v3285_v40 = vld [vmem:[#allocation2 + $0x50] sm:$0xf] }
  0xd5   : > { %2893 = vmatpush.bf16.msrb.mxu3 %v4461_v26  ;;  %v4941_v46 = vadd.f32 %v2521_v35, %v2503_v34  ;;  %v366_v26 = vld [vmem:[%s4832_s12 + $0xc0] sm:$0xff] }
  0xd6   : > { %2855 = vmatpush.bf16.msrb.mxu1 %v4445_v27  ;;  %v2485_v48 = vpop.f32.mrf.mxu1  ;;  %v391_v27 = vld [vmem:[%s4832_s12 + $0x188] sm:$0xff]  ;;  %v4447_v35 = vld [vmem:[#allocation5 + $0x580] sm:$0xff] }
  0xd7   : > { %2837 = vmatpush.bf16.msrb.mxu0 %v4436_v29  ;;  %v2486_v63 = vadd.f32 %v2485_v48, %v2467_v47  ;;  %v4431_v29 = vld [vmem:[#allocation5 + $0x500] sm:$0xff]  ;;  %v467_v31 = vpack.c.bf16 %v391_v27, %v391_v27  ;;  %v4244_v48 = vld [vmem:[#allocation2 + $0xb8] sm:$0xf0] }
  0xd8   : > { %2875 = vmatpush.bf16.msrb.mxu2 %v4452_v30  ;;  %v454_v30 = vpack.c.bf16 %v366_v26, %v366_v26  ;;  %v3294_v57 = vor.u32 %v4244_v48, %v3293_v44 }
  0xd9   : > { %2894 = vmatpush.bf16.msrb.mxu3 %v4460_v32  ;;  %v416_v32 = vld [vmem:[%s4832_s12 + $0x250] sm:$0xff] }
  0xda   : > { %2856 = vmatpush.bf16.msrb.mxu1 %v4444_v33  ;;  %v2504_v3 = vpop.f32.mrf.mxu2  ;;  %v480_v47 = vpack.c.bf16 %v416_v32, %v416_v32 }
  0xdb   : > { %2838 = vmatpush.bf16.msrb.mxu0 %v4435_v36  ;;  %v2505_v7 = vadd.f32 %v2504_v3, %v2486_v63  ;;  %v2523_v8 = vpop.f32.mrf.mxu3  ;;  %v4947_v11 = vpop.f32.mrf.mxu0  ;;  %v4455_v36 = vld [vmem:[#allocation5 + $0x5c0] sm:$0xff]  ;;  %v4468_v3 = vld [vmem:[#allocation5 + $0x628] sm:$0xff] }
  0xdc   : > { %2876 = vmatpush.bf16.msrb.mxu2 %v4451_v37  ;;  %v4705_v37 = vmov 0   ;;  %v2470_v2 = vadd.f32 %v4933_v6, %v4947_v11  ;;  %v3385_v11 = vld [vmem:[#allocation2 + $0x118] sm:$0xf] }
  0xdd   : > { %2895 = vmatpush.bf16.msrb.mxu3 %v4459_v41  ;;  %v4949_v14 = vadd.f32 %v2523_v8, %v2505_v7  ;;  %338 = vst [vmem:[#allocation2 + $0x60] sm:$0xf] %v4705_v37  ;;  %v4243_v41 = vld [vmem:[#allocation2 + $0xb0] sm:$0xf0] }
  0xde   : > { %2857 = vmatpush.bf16.msrb.mxu1 %v4443_v53  ;;  %v4951_v15 = vpop.f32.mrf.mxu1  ;;  %2772 = vmatmul.bf16.gmra.mxu0 %v3370_v9  ;;  %339 = vst [vmem:[#allocation2 + $0xc4] sm:$0xf] %v4705_v37  ;;  %v3286_v56 = vor.u32 %v4243_v41, %v3285_v40 }
  0xdf   : > { %2839 = vmatpush.bf16.msrb.mxu0 %v4434_v62  ;;  %2810 = vmatmul.bf16.gmra.mxu2 %v3378_v10  ;;  %507 = vst.msk [vmem:[#allocation2 + $0x60] sm:$0xf] %vm506_vm0, %v454_v30  ;;  %v2489_v9 = vadd.f32 %v4951_v15, %v2470_v2  ;;  %v3395_v15 = vld [vmem:[#allocation2 + $0x184] sm:$0xf0] }
  0xe0   : > { %2877 = vmatpush.bf16.msrb.mxu2 %v4450_v0  ;;  %2829 = vmatmul.bf16.gmra.mxu3 %v3382_v12  ;;  %520 = vst.msk [vmem:[#allocation2 + $0xc4] sm:$0xf] %vm506_vm0, %v467_v31  ;;  %v4469_v0 = vld [vmem:[#allocation5 + $0x630] sm:$0xff] }
  0xe1   : > { %2896 = vmatpush.bf16.msrb.mxu3 %v4458_v4  ;;  %2791 = vmatmul.bf16.gmra.mxu1 %v3374_v13  ;;  %340 = vst [vmem:[#allocation2 + $0x128] sm:$0xf] %v4705_v37  ;;  %v4467_v13 = vld [vmem:[#allocation5 + $0x620] sm:$0xff] }
  0xe2   : > { %2858 = vmatpush.bf16.msrb.mxu1 %v4442_v5  ;;  %v4953_v22 = vpop.f32.mrf.mxu2  ;;  %341 = vst [vmem:[#allocation2 + $0x18c] sm:$0xf] %v4705_v37 }
  0xe3   : > { %2840 = vmatpush.bf16.msrb.mxu0 %v4433_v16  ;;  %v4955_v25 = vpop.f32.mrf.mxu3  ;;  %v2471_v28 = vpop.f32.mrf.mxu0  ;;  %533 = vst.msk [vmem:[#allocation2 + $0x128] sm:$0xf] %vm506_vm0, %v480_v47  ;;  %v2508_v16 = vadd.f32 %v4953_v22, %v2489_v9 }
  0xe4   : > { %2878 = vmatpush.bf16.msrb.mxu2 %v4449_v17  ;;  %v2472_v33 = vadd.f32 %v4933_v6, %v2471_v28  ;;  %546 = vst.msk [vmem:[#allocation2 + $0x18c] sm:$0xf] %vm506_vm0, %v493_v50  ;;  %v4268_v17 = vld [vmem:[#allocation2 + $0x178] sm:$0xf0] }
  0xe5   : > { %2897 = vmatpush.bf16.msrb.mxu3 %v4457_v18  ;;  %v3393_v18 = vld [vmem:[#allocation2 + $0x120] sm:$0xf] }
  0xe6   : > { %2859 = vmatpush.bf16.msrb.mxu1 %v4441_v19  ;;  %v2490_v34 = vpop.f32.mrf.mxu1  ;;  %v4269_v19 = vld [vmem:[#allocation2 + $0x180] sm:$0xf0]  ;;  %v3301_v48 = vld [vmem:[#allocation2 + $0x60] sm:$0xf] }
  0xe7   : > { %2841 = vmatpush.bf16.msrb.mxu0 %v4432_v20  ;;  %v2491_v43 = vadd.f32 %v2490_v34, %v2472_v33  ;;  %v4257_v20 = vld [vmem:[#allocation2 + $0x124] sm:$0xf]  ;;  %v3394_v30 = vor.u32 %v4269_v19, %v3393_v18 }
  0xe8   : > { %2879 = vmatpush.bf16.msrb.mxu2 %v4448_v21  ;;  %v4466_v21 = vld [vmem:[#allocation5 + $0x618] sm:$0xff]  ;;  %v3398_v31 = vor.u32 %v4257_v20, %v3395_v15  ;;  %v4245_v49 = vld [vmem:[#allocation2 + $0xc0] sm:$0xf0] }
  0xe9   : > { %2898 = vmatpush.bf16.msrb.mxu3 %v4456_v23  ;;  %v4256_v23 = vld [vmem:[#allocation2 + $0x11c] sm:$0xf] }
  0xea   : > { %2860 = vmatpush.bf16.msrb.mxu1 %v4440_v24  ;;  %v2509_v53 = vpop.f32.mrf.mxu2  ;;  %v3387_v24 = vld [vmem:[#allocation2 + $0x17c] sm:$0xf0]  ;;  %v3401_v50 = vld [vmem:[#allocation2 + $0x128] sm:$0xf] }
  0xeb   : > { %2842 = vmatpush.bf16.msrb.mxu0 %v4431_v29  ;;  %v2510_v54 = vadd.f32 %v2509_v53, %v2491_v43  ;;  %v2528_v55 = vpop.f32.mrf.mxu3  ;;  %v2540_v58 = vpop.f32.mrf.mxu0  ;;  %v3386_v29 = vor.u32 %v4268_v17, %v3385_v11  ;;  %v3390_v32 = vor.u32 %v4256_v23, %v3387_v24  ;;  %v4270_v51 = vld [vmem:[#allocation2 + $0x188] sm:$0xf0] }
  0xec   : > { %2880 = vmatpush.bf16.msrb.mxu2 %v4447_v35  ;;  %v2541_v62 = vadd.f32 %v2540_v58, %v4941_v46 }
  0xed   : > { %2899 = vmatpush.bf16.msrb.mxu3 %v4455_v36  ;;  %v4966_v61 = vadd.f32 %v2528_v55, %v2510_v54  ;;  %v4465_v36 = vld [vmem:[#allocation5 + $0x610] sm:$0xff]  ;;  %v3302_v55 = vor.u32 %v4245_v49, %v3301_v48 }
  0xee   : > { %2861 = vmatpush.bf16.msrb.mxu1 %v4439_v39  ;;  %v2559_v63 = vpop.f32.mrf.mxu1  ;;  %2843 = vmatmul.bf16.vlgmr.msrb.gmra.mxu0 %v3286_v56 }
  0xef   : > { %2911 = vmatpush.bf16.msra.mxu0 %v4470_v42  ;;  %v2560_v1 = vadd.f32 %v2559_v63, %v2541_v62  ;;  %2881 = vmatmul.bf16.vlgmr.msrb.gmra.mxu2 %v3294_v57  ;;  %v3402_v57 = vor.u32 %v4270_v51, %v3401_v50 }
  0xf0   : > { %2900 = vmatmul.bf16.vlgmr.msrb.gmra.mxu3 %v3298_v59 }
  0xf1   : > { %4471 = vmatpush.bf16.msra.mxu3 %v4470_v42  ;;  %2862 = vmatmul.bf16.vlgmr.msrb.gmra.mxu1 %v3290_v60 }
  0xf2   : > { %v2578_v4 = vpop.f32.mrf.mxu2 }
  0xf3   : > { %2912 = vmatpush.bf16.msra.mxu0 %v4469_v0  ;;  %v2579_v5 = vadd.f32 %v2578_v4, %v2560_v1  ;;  %v2597_v7 = vpop.f32.mrf.mxu3  ;;  %v2542_v8 = vpop.f32.mrf.mxu0 }
  0xf4   : > { %v2543_v10 = vadd.f32 %v2542_v8, %v4949_v14  ;;  %v2527_v14 = vadd.f32 %v4955_v25, %v2508_v16  ;;  %v4464_v25 = vld [vmem:[#allocation5 + $0x608] sm:$0xff] }
  0xf5   : > { %4472 = vmatpush.bf16.msra.mxu3 %v4469_v0  ;;  %v4972_v46 = vadd.f32 %v2597_v7, %v2579_v5 }
  0xf6   : > { %v2561_v12 = vpop.f32.mrf.mxu1 }
  0xf7   : > { %2913 = vmatpush.bf16.msra.mxu0 %v4468_v3  ;;  %v2562_v6 = vadd.f32 %v2561_v12, %v2543_v10 }
  0xf9   : > { %4473 = vmatpush.bf16.msra.mxu3 %v4468_v3 }
  0xfa   : > { %v2580_v26 = vpop.f32.mrf.mxu2 }
  0xfb   : > { %2914 = vmatpush.bf16.msra.mxu0 %v4467_v13  ;;  %v2581_v27 = vadd.f32 %v2580_v26, %v2562_v6  ;;  %v2599_v28 = vpop.f32.mrf.mxu3  ;;  %v2545_v22 = vpop.f32.mrf.mxu0 }
  0xfc   : > { %v2546_v34 = vadd.f32 %v2545_v22, %v2527_v14 }
  0xfd   : > { %4474 = vmatpush.bf16.msra.mxu3 %v4467_v13  ;;  %v2600_v33 = vadd.f32 %v2599_v28, %v2581_v27 }
  0xfe   : > { %v2564_v35 = vpop.f32.mrf.mxu1  ;;  %2848 = vmatmul.bf16.gmra.mxu0 %v3386_v29 }
  0xff   : > { %2915 = vmatpush.bf16.msra.mxu0 %v4466_v21  ;;  %v2565_v37 = vadd.f32 %v2564_v35, %v2546_v34  ;;  %2886 = vmatmul.bf16.gmra.mxu2 %v3394_v30 }
 0x100   : > { %2905 = vmatmul.bf16.gmra.mxu3 %v3398_v31 }
 0x101   : > { %4475 = vmatpush.bf16.msra.mxu3 %v4466_v21  ;;  %2867 = vmatmul.bf16.gmra.mxu1 %v3390_v32 }
 0x102   : > { %v2583_v38 = vpop.f32.mrf.mxu2 }
 0x103   : > { %2916 = vmatpush.bf16.msra.mxu0 %v4465_v36  ;;  %v2584_v39 = vadd.f32 %v2583_v38, %v2565_v37  ;;  %v2602_v40 = vpop.f32.mrf.mxu3  ;;  %v2547_v41 = vpop.f32.mrf.mxu0 }
 0x104   : > { %v2548_v43 = vadd.f32 %v2547_v41, %v4966_v61 }
 0x105   : > { %4476 = vmatpush.bf16.msra.mxu3 %v4465_v36  ;;  %v2603_v42 = vadd.f32 %v2602_v40, %v2584_v39 }
 0x106   : > { %v2566_v44 = vpop.f32.mrf.mxu1 }
 0x107   : > { %2917 = vmatpush.bf16.msra.mxu0 %v4464_v25  ;;  %v2567_v47 = vadd.f32 %v2566_v44, %v2548_v43 }
 0x109   : > { %4477 = vmatpush.bf16.msra.mxu3 %v4464_v25 }
 0x10a   : > { %v2585_v52 = vpop.f32.mrf.mxu2 }
 0x10b   : > { %2918 = vmatpush.bf16.msra.mxu0 %v4463_v45  ;;  %v2586_v53 = vadd.f32 %v2585_v52, %v2567_v47  ;;  %v2604_v54 = vpop.f32.mrf.mxu3  ;;  %v2616_v56 = vpop.f32.mrf.mxu0 }
 0x10c   : > { %v2617_v59 = vadd.f32 %v2616_v56, %v4972_v46 }
 0x10d   : > { %4478 = vmatpush.bf16.msra.mxu3 %v4463_v45  ;;  %v2605_v58 = vadd.f32 %v2604_v54, %v2586_v53 }
 0x10e   : > { %v2635_v60 = vpop.f32.mrf.mxu1  ;;  %2919 = vmatmul.bf16.vlgmr.msra.gmra.mxu0 %v3302_v55 }
 0x10f   : > { %v2636_v61 = vadd.f32 %v2635_v60, %v2617_v59 }
 0x110   : > { %2924 = vmatmul.bf16.vlgmr.msra.gmra.mxu3 %v3402_v57 }
 0x112   : > { %v2654_v62 = vpop.f32.mrf.mxu2 }
 0x113   : > { %v2655_v63 = vadd.f32 %v2654_v62, %v2636_v61  ;;  %v2673_v0 = vpop.f32.mrf.mxu3  ;;  %v2618_v1 = vpop.f32.mrf.mxu0 }
 0x114   : > { %v2619_v3 = vadd.f32 %v2618_v1, %v2600_v33 }
 0x115   : > { %v2674_v2 = vadd.f32 %v2673_v0, %v2655_v63 }
 0x116   : > { %v2637_v4 = vpop.f32.mrf.mxu1 }
 0x117   : > { %v2638_v5 = vadd.f32 %v2637_v4, %v2619_v3 }
 0x11a   : > { %v2656_v7 = vpop.f32.mrf.mxu2 }
 0x11b   : > { %v2657_v8 = vadd.f32 %v2656_v7, %v2638_v5  ;;  %v2675_v9 = vpop.f32.mrf.mxu3  ;;  %v2621_v10 = vpop.f32.mrf.mxu0 }
 0x11c   : > { %v2622_v13 = vadd.f32 %v2621_v10, %v2603_v42 }
 0x11d   : > { %v2676_v12 = vadd.f32 %v2675_v9, %v2657_v8 }
 0x11e   : > { %v2640_v16 = vpop.f32.mrf.mxu1 }
 0x11f   : > { %v2641_v46 = vadd.f32 %v2640_v16, %v2622_v13 }
 0x122   : > { %v2659_v6 = vpop.f32.mrf.mxu2 }
 0x123   : > { %v2660_v11 = vadd.f32 %v2659_v6, %v2641_v46  ;;  %v2678_v17 = vpop.f32.mrf.mxu3  ;;  %v2623_v18 = vpop.f32.mrf.mxu0 }
 0x124   : > { %v2624_v20 = vadd.f32 %v2623_v18, %v2605_v58 }
 0x125   : > { %v2679_v19 = vadd.f32 %v2678_v17, %v2660_v11 }
 0x126   : > { %v2642_v21 = vpop.f32.mrf.mxu1 }
 0x127   : > { %v2643_v15 = vadd.f32 %v2642_v21, %v2624_v20 }
 0x12a   : > { %v2661_v23 = vpop.f32.mrf.mxu2 }
 0x12b   : > { %v2662_v24 = vadd.f32 %v2661_v23, %v2643_v15  ;;  %v2680_v26 = vpop.f32.mrf.mxu3  ;;  %v2692_v14 = vpop.f32.mrf.mxu0 }
 0x12c   : > { %v2693_v28 = vadd.f32 %v2692_v14, %v2674_v2 }
 0x12d   : > { %v2681_v27 = vadd.f32 %v2680_v26, %v2662_v24  ;;  %v2969_v24 = vld [vmem:[#allocation7 + $0x38] sm:$0xff] }
 0x12e   : > { %v2711_v29 = vpop.f32.mrf.mxu1  ;;  %4479 = vmatpush.msra.mxu1 %v2969_v24  ;;  %2995 = vmatpush.msrb.mxu0 %v2969_v24 }
 0x12f   : > { %v2712_v30 = vadd.f32 %v2711_v29, %v2693_v28  ;;  %v2967_v29 = vld [vmem:[#allocation7 + $0x28] sm:$0xff] }
 0x132   : > { %v2730_v22 = vpop.f32.mrf.mxu2 }
 0x133   : > { %v2731_v31 = vadd.f32 %v2730_v22, %v2712_v30  ;;  %v2749_v32 = vpop.f32.mrf.mxu3  ;;  %v2694_v33 = vpop.f32.mrf.mxu0 }
 0x134   : > { %v2695_v35 = vadd.f32 %v2694_v33, %v2676_v12 }
 0x135   : > { %v2750_v34 = vadd.f32 %v2749_v32, %v2731_v31  ;;  %v2966_v32 = vld [vmem:[#allocation7 + $0x20] sm:$0xff] }
 0x136   : > { %v2713_v36 = vpop.f32.mrf.mxu1 }
 0x137   : > { %v2714_v37 = vadd.f32 %v2713_v36, %v2695_v35 }
 0x13a   : > { %v2732_v25 = vpop.f32.mrf.mxu2 }
 0x13b   : > { %v2733_v38 = vadd.f32 %v2732_v25, %v2714_v37  ;;  %v2751_v39 = vpop.f32.mrf.mxu3  ;;  %v2697_v40 = vpop.f32.mrf.mxu0  ;;  %v2965_v37 = vld [vmem:[#allocation7 + $0x18] sm:$0xff] }
 0x13c   : > { %v2698_v3 = vadd.f32 %v2697_v40, %v2679_v19  ;;  %v2968_v19 = vld [vmem:[#allocation7 + $0x30] sm:$0xff] }
 0x13d   : > { %v2752_v41 = vadd.f32 %v2751_v39, %v2733_v38  ;;  %4480 = vmatpush.msra.mxu1 %v2968_v19  ;;  %2996 = vmatpush.msrb.mxu0 %v2968_v19  ;;  %v2964_v39 = vld [vmem:[#allocation7 + $0x10] sm:$0xff]  ;;  %v3051_v19 = vld [vmem:[%s5039_s5 + $0x18] sm:$0xff] }
 0x13e   : > { %v2716_v42 = vpop.f32.mrf.mxu1  ;;  %3081 = vmatpush.msra.mxu2 %v3051_v19  ;;  %4487 = vmatpush.msrb.mxu3 %v3051_v19 }
 0x13f   : > { %v2717_v7 = vadd.f32 %v2716_v42, %v2698_v3  ;;  %4481 = vmatpush.msra.mxu1 %v2967_v29  ;;  %2997 = vmatpush.msrb.mxu0 %v2967_v29 }
 0x141   : > { %4482 = vmatpush.msra.mxu1 %v2966_v32  ;;  %2998 = vmatpush.msrb.mxu0 %v2966_v32 }
 0x142   : > { %v2735_v43 = vpop.f32.mrf.mxu2 }
 0x143   : > { %v2754_v44 = vpop.f32.mrf.mxu3  ;;  %v2699_v45 = vpop.f32.mrf.mxu0  ;;  %v2736_v12 = vadd.f32 %v2735_v43, %v2717_v7  ;;  %4483 = vmatpush.msra.mxu1 %v2965_v37  ;;  %2999 = vmatpush.msrb.mxu0 %v2965_v37 }
 0x144   : > { %v2700_v13 = vadd.f32 %v2699_v45, %v2681_v27 }
 0x145   : > { %v2755_v46 = vadd.f32 %v2754_v44, %v2736_v12  ;;  %3000 = vmatpush.msrb.mxu0 %v2964_v39  ;;  %4484 = vmatpush.msra.mxu1 %v2964_v39 }
 0x146   : > { %v2718_v47 = vpop.f32.mrf.mxu1 }
 0x147   : > { %v2719_v17 = vadd.f32 %v2718_v47, %v2700_v13 }
 0x14a   : > { %v2737_v48 = vpop.f32.mrf.mxu2 }
 0x14b   : > { %v2756_v49 = vpop.f32.mrf.mxu3  ;;  %v2768_v50 = vpop.f32.mrf.mxu0  ;;  %v2738_v23 = vadd.f32 %v2737_v48, %v2719_v17 }
 0x14c   : > { %v2769_v9 = vadd.f32 %v2768_v50, %v2750_v34 }
 0x14d   : > { %v2757_v22 = vadd.f32 %v2756_v49, %v2738_v23 }
 0x14e   : > { %v2787_v51 = vpop.f32.mrf.mxu1 }
 0x14f   : > { %v2788_v16 = vadd.f32 %v2787_v51, %v2769_v9  ;;  %v2963_v9 = vld [vmem:[#allocation7 + $0x8] sm:$0xff] }
 0x150   : > { %3001 = vmatpush.msrb.mxu0 %v2963_v9  ;;  %4485 = vmatpush.msra.mxu1 %v2963_v9 }
 0x152   : > { %v2806_v52 = vpop.f32.mrf.mxu2 }
 0x153   : > { %v2825_v53 = vpop.f32.mrf.mxu3  ;;  %v2770_v54 = vpop.f32.mrf.mxu0  ;;  %v2807_v6 = vadd.f32 %v2806_v52, %v2788_v16  ;;  %v4707_v16 = vmov 0.0  }
 0x154   : > { %v2771_v21 = vadd.f32 %v2770_v54, %v2752_v41 }
 0x155   : > { %v2826_v26 = vadd.f32 %v2825_v53, %v2807_v6 }
 0x156   : > { %v2789_v55 = vpop.f32.mrf.mxu1 }
 0x157   : > { %v2790_v30 = vadd.f32 %v2789_v55, %v2771_v21 }
 0x15a   : > { %v2808_v56 = vpop.f32.mrf.mxu2 }
 0x15b   : > { %v2827_v57 = vpop.f32.mrf.mxu3  ;;  %v2773_v58 = vpop.f32.mrf.mxu0  ;;  %v2809_v33 = vadd.f32 %v2808_v56, %v2790_v30 }
 0x15c   : > { %v2774_v18 = vadd.f32 %v2773_v58, %v2755_v46 }
 0x15d   : > { %v2828_v40 = vadd.f32 %v2827_v57, %v2809_v33 }
 0x15e   : > { %v2792_v59 = vpop.f32.mrf.mxu1 }
 0x15f   : > { %v2793_v28 = vadd.f32 %v2792_v59, %v2774_v18 }
 0x162   : > { %v2811_v60 = vpop.f32.mrf.mxu2 }
 0x163   : > { %v2830_v61 = vpop.f32.mrf.mxu3  ;;  %v2775_v62 = vpop.f32.mrf.mxu0  ;;  %v2812_v31 = vadd.f32 %v2811_v60, %v2793_v28 }
 0x164   : > { %v2776_v35 = vadd.f32 %v2775_v62, %v2757_v22 }
 0x165   : > { %v2831_v38 = vadd.f32 %v2830_v61, %v2812_v31 }
 0x166   : > { %v2794_v63 = vpop.f32.mrf.mxu1 }
 0x167   : > { %v2795_v43 = vadd.f32 %v2794_v63, %v2776_v35  ;;  %v3048_v35 = vld [vmem:[%s5039_s5] sm:$0xff] }
 0x16a   : > { %v2813_v0 = vpop.f32.mrf.mxu2 }
 0x16b   : > { %v4979_v1 = vpop.f32.mrf.mxu3  ;;  %v2844_v2 = vpop.f32.mrf.mxu0  ;;  %v2814_v48 = vadd.f32 %v2813_v0, %v2795_v43 }
 0x16c   : > { %v2845_v27 = vadd.f32 %v2844_v2, %v2826_v26  ;;  %v3050_v26 = vld [vmem:[%s5039_s5 + $0x10] sm:$0xff] }
 0x16d   : > { %v2833_v55 = vadd.f32 %v4979_v1, %v2814_v48  ;;  %3082 = vmatpush.msra.mxu2 %v3050_v26  ;;  %4488 = vmatpush.msrb.mxu3 %v3050_v26  ;;  %v4566_v48 = vld [vmem:[%s5040_s6] ss:$0 sm:$0xff] }
 0x16e   : > { %v2863_v4 = vpop.f32.mrf.mxu1 }
 0x16f   : > { %v2864_v25 = vadd.f32 %v2863_v4, %v2845_v27 }
 0x172   : > { %v2882_v10 = vpop.f32.mrf.mxu2 }
 0x173   : > { %v2901_v5 = vpop.f32.mrf.mxu3  ;;  %v2846_v8 = vpop.f32.mrf.mxu0  ;;  %v2883_v41 = vadd.f32 %v2882_v10, %v2864_v25  ;;  %v2962_v10 = vld [vmem:[#allocation7] sm:$0xff] }
 0x174   : > { %v2847_v45 = vadd.f32 %v2846_v8, %v2828_v40  ;;  %3002 = vmatpush.msrb.mxu0 %v2962_v10  ;;  %4486 = vmatpush.msra.mxu1 %v2962_v10 }
 0x175   : > { %v2902_v49 = vadd.f32 %v2901_v5, %v2883_v41 }
 0x176   : > { %v2865_v15 = vpop.f32.mrf.mxu1 }
 0x177   : > { %v2866_v53 = vadd.f32 %v2865_v15, %v2847_v45 }
 0x17a   : > { %v2884_v14 = vpop.f32.mrf.mxu2 }
 0x17b   : > { %v2903_v11 = vpop.f32.mrf.mxu3  ;;  %v2849_v20 = vpop.f32.mrf.mxu0  ;;  %v2885_v57 = vadd.f32 %v2884_v14, %v2866_v53  ;;  %v4565_v14 = vld [vmem:[%s5038_s4] ss:$0 sm:$0xff] }
 0x17c   : > { %v2850_v44 = vadd.f32 %v2849_v20, %v2831_v38 }
 0x17d   : > { %v2904_v61 = vadd.f32 %v2903_v11, %v2885_v57 }
 0x17e   : > { %v2868_v42 = vpop.f32.mrf.mxu1 }
 0x17f   : > { %v2869_v51 = vadd.f32 %v2868_v42, %v2850_v44 }
 0x182   : > { %v2887_v47 = vpop.f32.mrf.mxu2 }
 0x183   : > { %v2906_v34 = vpop.f32.mrf.mxu3  ;;  %v2851_v36 = vpop.f32.mrf.mxu0  ;;  %v2888_v56 = vadd.f32 %v2887_v47, %v2869_v51 }
 0x184   : > { %v2852_v58 = vadd.f32 %v2851_v36, %v2833_v55 }
 0x185   : > { %v2907_v60 = vadd.f32 %v2906_v34, %v2888_v56  ;;  %v3049_v34 = vld [vmem:[%s5039_s5 + $0x8] sm:$0xff] }
 0x186   : > { %v2870_v59 = vpop.f32.mrf.mxu1  ;;  %3083 = vmatpush.msra.mxu2 %v3049_v34  ;;  %4489 = vmatpush.msrb.mxu3 %v3049_v34 }
 0x187   : > { %v2871_v2 = vadd.f32 %v2870_v59, %v2852_v58 }
 0x188   : > { %3084 = vmatpush.msra.mxu2 %v3048_v35  ;;  %4490 = vmatpush.msrb.mxu3 %v3048_v35 }
 0x18a   : > { %v2889_v62 = vpop.f32.mrf.mxu2 }
 0x18b   : > { %v2908_v50 = vpop.f32.mrf.mxu3  ;;  %v2920_v52 = vpop.f32.mrf.mxu0  ;;  %v2890_v5 = vadd.f32 %v2889_v62, %v2871_v2 }
 0x18c   : > { %v2921_v54 = vadd.f32 %v2920_v52, %v2902_v49 }
 0x18d   : > { %v2909_v7 = vadd.f32 %v2908_v50, %v2890_v5 }
 0x18e   : > { %2934 = vrot.lane.b32.xlu0 %v2921_v54, %s4706_s30 }
 0x193   : > { %v2925_v63 = vpop.f32.mrf.mxu3  ;;  %v2922_v3 = vpop.f32.mrf.mxu0 }
 0x194   : > { %v2926_v0 = vadd.f32 %v2925_v63, %v2907_v60  ;;  %v2923_v4 = vadd.f32 %v2922_v3, %v2904_v61 }
 0x196   : > { %2938 = vrot.lane.b32.xlu1 %v2926_v0, %s4706_s30  ;;  %2936 = vrot.lane.b32.xlu0 %v2923_v4, %s4706_s30 }
 0x19b   : > { %v2927_v8 = vpop.f32.mrf.mxu3 }
 0x19c   : > { %v2928_v1 = vadd.f32 %v2927_v8, %v2909_v7 }
 0x19e   : > { %2940 = vrot.lane.b32.xlu1 %v2928_v1, %s4706_s30 }
 0x200   : > { %v2935_v12 = vpop.permute.xlu0 %2934 }
 0x201   : > { %v2946_v13 = vmax.f32 %v2921_v54, %v2935_v12 }
 0x203   : > { %vm2950_vm2 = vcmp.gt.f32.partialorder %v2946_v13, 1.0 }
 0x204   : > { %v4203_v46 = vsel %vm2950_vm2, 1.0, %v4707_v16 }
 0x205   : > { %4207 = vmatmul.msk.f32.vlgmr.msrb.gmra.mxu0 %vm2974_vm1, %v4203_v46 }
 0x208   : > { %v2939_v6 = vpop.permute.xlu1 %2938  ;;  %v2937_v11 = vpop.permute.xlu0 %2936 }
 0x209   : > { %v2947_v17 = vmax.f32 %v2923_v4, %v2937_v11  ;;  %v2948_v20 = vmax.f32 %v2926_v0, %v2939_v6 }
 0x20b   : > { %vm2951_vm3 = vcmp.gt.f32.partialorder %v2947_v17, 1.0  ;;  %vm2952_vm4 = vcmp.gt.f32.partialorder %v2948_v20, 1.0 }
 0x20c   : > { %v4204_v18 = vsel %vm2951_vm3, 1.0, %v4707_v16  ;;  %v4205_v15 = vsel %vm2952_vm4, 1.0, %v4707_v16 }
 0x20d   : > { %4208 = vmatmul.msk.f32.vlgmr.msra.gmra.mxu1 %vm2974_vm1, %v4204_v18 }
 0x210   : > { %v2941_v21 = vpop.permute.xlu1 %2940 }
 0x211   : > { %v2949_v23 = vmax.f32 %v2928_v1, %v2941_v21 }
 0x213   : > { %vm2953_vm5 = vcmp.gt.f32.partialorder %v2949_v23, 1.0 }
 0x214   : > { %v4206_v24 = vsel %vm2953_vm5, 1.0, %v4707_v16 }
 0x215   : > { %4209 = vmatmul.msk.f32.gmra.mxu1 %vm2974_vm1, %v4205_v15 }
 0x21d   : > { %4210 = vmatmul.msk.f32.gmra.mxu1 %vm2974_vm1, %v4206_v24 }
 0x282   : > { %v3004_v28 = vpop.f32.mrf.mxu0 }
 0x283   : > { %v3005_v29 = vadd.f32 %v4565_v14, %v3004_v28 }
 0x285   : > { %3020 = vrot.lane.b32.xlu2 %v3005_v29, %s4708_s24 }
 0x28a   : > { %v3007_v30 = vpop.f32.mrf.mxu1 }
 0x28b   : > { %v3008_v27 = vadd.f32 %v4565_v14, %v3007_v30 }
 0x28d   : > { %3022 = vrot.lane.b32.xlu2 %v3008_v27, %s4708_s24 }
 0x292   : > { %v3010_v22 = vpop.f32.mrf.mxu1 }
 0x293   : > { %v3011_v31 = vadd.f32 %v4565_v14, %v3010_v22 }
 0x295   : > { %3024 = vrot.lane.b32.xlu0 %v3011_v31, %s4708_s24 }
 0x29a   : > { %v3013_v32 = vpop.f32.mrf.mxu1 }
 0x29b   : > { %v3014_v33 = vadd.f32 %v4565_v14, %v3013_v32 }
 0x29d   : > { %3026 = vrot.lane.b32.xlu1 %v3014_v33, %s4708_s24 }
 0x2df   : > { %v3021_v36 = vpop.permute.xlu2 %3020 }
 0x2e0   : > { %v3032_v37 = vmax.f32 %v3005_v29, %v3021_v36 }
 0x2e2   : > { %vm3036_vm7 = vcmp.gt.f32.partialorder %v3032_v37, 1.0 }
 0x2e3   : > { %v4211_v25 = vsel %vm3036_vm7, 1.0, %v4707_v16 }
 0x2e4   : > { %4215 = vmatmul.msk.f32.vlgmr.msra.gmra.mxu2 %vm3056_vm6, %v4211_v25 }
 0x2e7   : > { %v3023_v38 = vpop.permute.xlu2 %3022 }
 0x2e8   : > { %v3033_v39 = vmax.f32 %v3008_v27, %v3023_v38 }
 0x2ea   : > { %vm3037_vm8 = vcmp.gt.f32.partialorder %v3033_v39, 1.0 }
 0x2eb   : > { %v4212_v40 = vsel %vm3037_vm8, 1.0, %v4707_v16 }
 0x2ec   : > { %4216 = vmatmul.msk.f32.gmra.mxu2 %vm3056_vm6, %v4212_v40 }
 0x307   : > { %v3025_v41 = vpop.permute.xlu0 %3024 }
 0x308   : > { %v3034_v42 = vmax.f32 %v3011_v31, %v3025_v41 }
 0x30a   : > { %vm3038_vm9 = vcmp.gt.f32.partialorder %v3034_v42, 1.0 }
 0x30b   : > { %v4213_v43 = vsel %vm3038_vm9, 1.0, %v4707_v16 }
 0x30c   : > { %4217 = vmatmul.msk.f32.gmra.mxu2 %vm3056_vm6, %v4213_v43 }
 0x30f   : > { %v3027_v44 = vpop.permute.xlu1 %3026 }
 0x310   : > { %v3035_v45 = vmax.f32 %v3014_v33, %v3027_v44 }
 0x312   : > { %vm3039_vm10 = vcmp.gt.f32.partialorder %v3035_v45, 1.0 }
 0x313   : > { %v4214_v47 = vsel %vm3039_vm10, 1.0, %v4707_v16 }
 0x314   : > { %4218 = vmatmul.msk.f32.vlgmr.msrb.gmra.mxu3 %vm3056_vm6, %v4214_v47 }
 0x367   : > { %v3086_v49 = vpop.f32.mrf.mxu2 }
 0x368   : > { %v3087_v50 = vadd.f32 %v4566_v48, %v3086_v49 }
 0x36a   : > { %3099 = vst.msk [vmem:[%s335_s11] sm:$0xff] %vm3098_vm11, %v3087_v50 }
 0x36f   : > { %v3089_v51 = vpop.f32.mrf.mxu2 }
 0x370   : > { %v3090_v52 = vadd.f32 %v4566_v48, %v3089_v51 }
 0x372   : > { %3100 = vst.msk [vmem:[%s335_s11 + $0x8] sm:$0xff] %vm3098_vm11, %v3090_v52 }
 0x38f   : > { %v3092_v53 = vpop.f32.mrf.mxu2 }
 0x390   : > { %v3093_v54 = vadd.f32 %v4566_v48, %v3092_v53 }
 0x392   : > { %3101 = vst.msk [vmem:[%s335_s11 + $0x10] sm:$0xff] %vm3098_vm11, %v3093_v54 }
 0x397   : > { %v3095_v55 = vpop.f32.mrf.mxu3 }
 0x398   : > { %v3096_v56 = vadd.f32 %v4566_v48, %v3095_v55 }
 0x39a   : > { %3102 = vst.msk [vmem:[%s335_s11 + $0x18] sm:$0xff] %vm3098_vm11, %v3096_v56 }
 0x39b PF: > { %p18_p4 = scmp.ge.s32.totalorder %s4798_s23, 4   ;;  %s5048_s24 = smov %s4687_s25 }
 0x39c   : > { %s5049_s25 = smov %s4691_s26  ;;  %s5050_s26 = smov %s4807_s9 }
 0x39d   : > { %s5051_s27 = smov %s4798_s23  ;;  %20 = sbr.rel (!%p18_p4) target bundleno = 4 (0x4), region = 96 }
 0x3a2   :  { %3125 = vsyncpa [#allocation4], 1 }
 0x3a3   :  { %3127 = vsyncpa [#allocation4 + $0x1], 1 }
 0x3a4   :  { %3128 = vsyncpa [#allocation6], 1 }

</bundles_post_ra>
